<compile_context>
chip_gen: v5e
topology: v5e:2x2
jax: 0.10.0
libtpu: 0.0.40
codegen_flags: <defaults>
</compile_context>

<pallas_src>
import jax
import jax.numpy as jnp
from jax.experimental import pallas as pl
from jax.experimental.pallas import tpu as pltpu

HIDDEN = 500
CODE = 100

# Lane-aligned padded dims (multiples of 128) used inside the kernel.
HIDDEN_P = 512
CODE_P = 128
LANE = 128
SUBLANE = 8
TB_TARGET = 512  # batch rows per grid step (target)


def _round_up(n, m):
    return ((n + m - 1) // m) * m


def _pad2d(a, rows, cols):
    if a.shape == (rows, cols):
        return a
    return jnp.pad(a, ((0, rows - a.shape[0]), (0, cols - a.shape[1])))


def prepare_params(params, *, compute_dtype=jnp.bfloat16):
    """One-time lane-padding + cast of weights/biases to MXU-ready layout.

    Hoisted out of the forward pass so it is NOT re-executed per call.
    Zero padding keeps the math exact (padded rows/cols contribute 0).
    """
    F = params["w1"].shape[0]
    F_p = _round_up(F, LANE)
    return dict(
        w1=_pad2d(params["w1"], F_p, HIDDEN_P).astype(compute_dtype),
        b1=_pad2d(params["b1"], 1, HIDDEN_P).astype(jnp.float32),
        w2=_pad2d(params["w2"], HIDDEN_P, CODE_P).astype(compute_dtype),
        b2=_pad2d(params["b2"], 1, CODE_P).astype(jnp.float32),
        w3=_pad2d(params["w3"], CODE_P, HIDDEN_P).astype(compute_dtype),
        b3=_pad2d(params["b3"], 1, HIDDEN_P).astype(jnp.float32),
        w4=_pad2d(params["w4"], HIDDEN_P, F_p).astype(compute_dtype),
        b4=_pad2d(params["b4"], 1, F_p).astype(jnp.float32),
    )


def _ae_kernel(x_ref, w1_ref, b1_ref, w2_ref, b2_ref,
               w3_ref, b3_ref, w4_ref, b4_ref,
               enc_ref, dec_ref):
    # x arrives in f32; cast to the MXU input dtype on the VPU (hides under
    # MXU time). Accumulation in f32; tanh/bias adds in f32 (v5e VPU/EUP have
    # no bf16 path).
    x = x_ref[...].astype(w1_ref.dtype)

    # encoder: Linear(F,512p) -> Dropout(id) -> Tanh -> Linear(512p,128p) -> Dropout(id)
    h1 = jnp.tanh(
        jnp.dot(x, w1_ref[...], preferred_element_type=jnp.float32) + b1_ref[...]
    )
    enc = jnp.dot(h1.astype(w2_ref.dtype), w2_ref[...],
                  preferred_element_type=jnp.float32) + b2_ref[...]
    enc_ref[...] = enc.astype(enc_ref.dtype)

    # decoder: Linear(128p,512p) -> Dropout(id) -> Tanh -> Linear(512p,F)
    h2 = jnp.tanh(
        jnp.dot(enc.astype(w3_ref.dtype), w3_ref[...],
                preferred_element_type=jnp.float32) + b3_ref[...]
    )
    dec = jnp.dot(h2.astype(w4_ref.dtype), w4_ref[...],
                  preferred_element_type=jnp.float32) + b4_ref[...]
    dec_ref[...] = dec.astype(dec_ref.dtype)


def _choose_batch_tiling(B):
    """Pick (B_p, TB, n_steps): near-TB_TARGET tiles, <8 wasted rows per step,
    and >=2 grid steps whenever B exceeds one tile (v7x megacore)."""
    B8 = _round_up(B, SUBLANE)
    if B8 <= TB_TARGET:
        return B8, B8, 1
    n_steps = -(-B8 // TB_TARGET)                  # ceil
    TB = _round_up(-(-B8 // n_steps), SUBLANE)     # near-equal split, sublane aligned
    return TB * n_steps, TB, n_steps


def autoencoder_forward(x, pp, *, out_dtype=jnp.float32):
    """x: [B, F] float32. pp: prepare_params() output (padded, bf16 weights).
    Returns (encoded [B,100], decoded [B,F]) in out_dtype."""
    B, F = x.shape
    F_p = pp["w1"].shape[0]
    assert F_p == _round_up(F, LANE), "pp was prepared for a different feature_length"

    B_p, TB, n_steps = _choose_batch_tiling(B)

    # Only pad x when actually needed (skip the extra HBM pass when aligned).
    needs_pad = (B_p != B) or (F_p != F)
    x_p = _pad2d(x, B_p, F_p) if needs_pad else x

    # BlockSpecs: batch-tiled streams vs VMEM-resident (single-buffered) constants.
    row = lambda shape: pl.BlockSpec(shape, lambda i: (i, 0))
    fixed = lambda a: pl.BlockSpec(a.shape, lambda i: (0, 0),
                                   pipeline_mode=pl.Buffered(1))

    out_itemsize = jnp.dtype(out_dtype).itemsize
    weight_bytes = sum(int(pp[k].size) * pp[k].dtype.itemsize
                       for k in ("w1", "b1", "w2", "b2", "w3", "b3", "w4", "b4"))
    # single-buffered weights + double-buffered x/enc/dec tiles + f32 intermediates
    tile_bytes = TB * (F_p * 4 + CODE_P * out_itemsize + F_p * out_itemsize)
    interm_bytes = 2 * TB * HIDDEN_P * 4
    vmem_est = weight_bytes + 2 * tile_bytes + interm_bytes
    vmem_limit = int(min(max(2 * vmem_est, 32 << 20), 60 << 20))

    flops = 2 * B_p * (F_p * HIDDEN_P + HIDDEN_P * CODE_P
                       + CODE_P * HIDDEN_P + HIDDEN_P * F_p)
    bytes_accessed = (B_p * F_p * 4 + weight_bytes
                      + B_p * CODE_P * out_itemsize + B_p * F_p * out_itemsize)

    enc_p, dec_p = pl.pallas_call(
        _ae_kernel,
        out_shape=(
            jax.ShapeDtypeStruct((B_p, CODE_P), out_dtype),
            jax.ShapeDtypeStruct((B_p, F_p), out_dtype),
        ),
        grid=(n_steps,),
        in_specs=[
            row((TB, F_p)),
            fixed(pp["w1"]), fixed(pp["b1"]),
            fixed(pp["w2"]), fixed(pp["b2"]),
            fixed(pp["w3"]), fixed(pp["b3"]),
            fixed(pp["w4"]), fixed(pp["b4"]),
        ],
        out_specs=(
            row((TB, CODE_P)),
            row((TB, F_p)),
        ),
        compiler_params=pltpu.CompilerParams(
            dimension_semantics=("parallel",),
            vmem_limit_bytes=vmem_limit,
        ),
        cost_estimate=pl.CostEstimate(
            flops=flops,
            transcendentals=2 * B_p * HIDDEN_P,
            bytes_accessed=bytes_accessed,
        ),
    )(x_p, pp["w1"], pp["b1"], pp["w2"], pp["b2"],
      pp["w3"], pp["b3"], pp["w4"], pp["b4"])

    # Strip batch / lane padding back to logical shapes (skip when not needed).
    enc = enc_p[:B, :CODE]
    dec = dec_p if not needs_pad else dec_p[:B, :F]
    return enc, dec


def init_params(key, feature_length):
    """Deterministic PyTorch-style Linear init: U(-1/sqrt(fan_in), 1/sqrt(fan_in))."""
    def linear(k, fan_in, fan_out):
        kw, kb = jax.random.split(k)
        bound = 1.0 / jnp.sqrt(fan_in)
        w = jax.random.uniform(kw, (fan_in, fan_out), jnp.float32, -bound, bound)
        b = jax.random.uniform(kb, (1, fan_out), jnp.float32, -bound, bound)
        return w, b

    k1, k2, k3, k4 = jax.random.split(key, 4)
    w1, b1 = linear(k1, feature_length, HIDDEN)
    w2, b2 = linear(k2, HIDDEN, CODE)
    w3, b3 = linear(k3, CODE, HIDDEN)
    w4, b4 = linear(k4, HIDDEN, feature_length)
    return dict(w1=w1, b1=b1, w2=w2, b2=b2, w3=w3, b3=b3, w4=w4, b4=b4)


def reference_forward(x, p):
    h1 = jnp.tanh(x @ p["w1"] + p["b1"])
    enc = h1 @ p["w2"] + p["b2"]
    h2 = jnp.tanh(enc @ p["w3"] + p["b3"])
    dec = h2 @ p["w4"] + p["b4"]
    return enc, dec


if __name__ == "__main__":
    feature_length = 256
    batch = 8

    key = jax.random.PRNGKey(0)
    kx, kp = jax.random.split(key)
    x = jax.random.normal(kx, (batch, feature_length), jnp.float32)
    params = init_params(kp, feature_length)

    # One-time weight padding/cast, outside the per-call (jit'd) path.
    pp = jax.block_until_ready(prepare_params(params))

    fwd = jax.jit(autoencoder_forward)
    enc, dec = fwd(x, pp)
    jax.block_until_ready((enc, dec))

    enc_ref, dec_ref = reference_forward(x, params)
    assert enc.shape == (batch, CODE) and dec.shape == (batch, feature_length)
    # bf16 matmul inputs with f32 accumulation: loose tolerance vs. f32 reference.
    assert jnp.allclose(enc, enc_ref, atol=3e-2, rtol=3e-2)
    assert jnp.allclose(dec, dec_ref, atol=3e-2, rtol=3e-2)

    print("KERNEL_OK")
</pallas_src>

<mosaic_0001>
module attributes {stable_mosaic.version = 11 : i64} {
  func.func @_ae_kernel(%arg0: i32, %arg1: memref<8x256xf32, #tpu.memory_space<vmem>>, %arg2: memref<256x512xbf16, #tpu.memory_space<vmem>>, %arg3: memref<1x512xf32, #tpu.memory_space<vmem>>, %arg4: memref<512x128xbf16, #tpu.memory_space<vmem>>, %arg5: memref<1x128xf32, #tpu.memory_space<vmem>>, %arg6: memref<128x512xbf16, #tpu.memory_space<vmem>>, %arg7: memref<1x512xf32, #tpu.memory_space<vmem>>, %arg8: memref<512x256xbf16, #tpu.memory_space<vmem>>, %arg9: memref<1x256xf32, #tpu.memory_space<vmem>>, %arg10: memref<8x128xf32, #tpu.memory_space<vmem>>, %arg11: memref<8x256xf32, #tpu.memory_space<vmem>>) attributes {dimension_semantics = [#tpu.dimension_semantics<parallel>], iteration_bounds = array<i64: 1>, scalar_prefetch = 0 : i64, scratch_operands = 0 : i64, tpu.core_type = #tpu.core_type<tc>, window_params = [{transform_indices = @transform_0, window_bounds = array<i64: 8, 256>}, {pipeline_mode = #tpu.pipeline_mode<synchronous>, transform_indices = @transform_1, window_bounds = array<i64: 256, 512>}, {pipeline_mode = #tpu.pipeline_mode<synchronous>, transform_indices = @transform_2, window_bounds = array<i64: 1, 512>}, {pipeline_mode = #tpu.pipeline_mode<synchronous>, transform_indices = @transform_3, window_bounds = array<i64: 512, 128>}, {pipeline_mode = #tpu.pipeline_mode<synchronous>, transform_indices = @transform_4, window_bounds = array<i64: 1, 128>}, {pipeline_mode = #tpu.pipeline_mode<synchronous>, transform_indices = @transform_5, window_bounds = array<i64: 128, 512>}, {pipeline_mode = #tpu.pipeline_mode<synchronous>, transform_indices = @transform_6, window_bounds = array<i64: 1, 512>}, {pipeline_mode = #tpu.pipeline_mode<synchronous>, transform_indices = @transform_7, window_bounds = array<i64: 512, 256>}, {pipeline_mode = #tpu.pipeline_mode<synchronous>, transform_indices = @transform_8, window_bounds = array<i64: 1, 256>}, {transform_indices = @transform_9, window_bounds = array<i64: 8, 128>}, {transform_indices = @transform_10, window_bounds = array<i64: 8, 256>}]} {
    %c0 = arith.constant 0 : index
    %c0_0 = arith.constant 0 : index
    %0 = vector.load %arg1[%c0, %c0_0] : memref<8x256xf32, #tpu.memory_space<vmem>>, vector<8x256xf32>
    %1 = arith.truncf %0 : vector<8x256xf32> to vector<8x256xbf16>
    %c0_1 = arith.constant 0 : index
    %c0_2 = arith.constant 0 : index
    %2 = vector.load %arg2[%c0_1, %c0_2] : memref<256x512xbf16, #tpu.memory_space<vmem>>, vector<256x512xbf16>
    %cst = arith.constant dense<0.000000e+00> : vector<8x512xf32>
    %3 = tpu.matmul %1, %2, %cst {dimension_numbers = #tpu.dot_dimension_numbers<[1], [0], [0], [1], [0, 0, 1, 1], [], []>} : vector<8x256xbf16>, vector<256x512xbf16>, vector<8x512xf32> -> vector<8x512xf32>
    %c0_3 = arith.constant 0 : index
    %c0_4 = arith.constant 0 : index
    %4 = vector.load %arg3[%c0_3, %c0_4] : memref<1x512xf32, #tpu.memory_space<vmem>>, vector<1x512xf32>
    %5 = vector.broadcast %4 : vector<1x512xf32> to vector<8x512xf32>
    %6 = arith.addf %3, %5 : vector<8x512xf32>
    %7 = math.tanh %6 : vector<8x512xf32>
    %8 = arith.truncf %7 : vector<8x512xf32> to vector<8x512xbf16>
    %c0_5 = arith.constant 0 : index
    %c0_6 = arith.constant 0 : index
    %9 = vector.load %arg4[%c0_5, %c0_6] : memref<512x128xbf16, #tpu.memory_space<vmem>>, vector<512x128xbf16>
    %cst_7 = arith.constant dense<0.000000e+00> : vector<8x128xf32>
    %10 = tpu.matmul %8, %9, %cst_7 {dimension_numbers = #tpu.dot_dimension_numbers<[1], [0], [0], [1], [0, 0, 1, 1], [], []>} : vector<8x512xbf16>, vector<512x128xbf16>, vector<8x128xf32> -> vector<8x128xf32>
    %c0_8 = arith.constant 0 : index
    %c0_9 = arith.constant 0 : index
    %11 = vector.load %arg5[%c0_8, %c0_9] : memref<1x128xf32, #tpu.memory_space<vmem>>, vector<1x128xf32>
    %12 = vector.broadcast %11 : vector<1x128xf32> to vector<8x128xf32>
    %13 = arith.addf %10, %12 : vector<8x128xf32>
    %c0_10 = arith.constant 0 : index
    %c0_11 = arith.constant 0 : index
    %14 = vector.load %arg10[%c0_10, %c0_11] : memref<8x128xf32, #tpu.memory_space<vmem>>, vector<8x128xf32>
    tpu.vector_store %arg10[%c0_10, %c0_11], %13 {strides = array<i32>} : memref<8x128xf32, #tpu.memory_space<vmem>>, vector<8x128xf32>,
    %15 = arith.truncf %13 : vector<8x128xf32> to vector<8x128xbf16>
    %c0_12 = arith.constant 0 : index
    %c0_13 = arith.constant 0 : index
    %16 = vector.load %arg6[%c0_12, %c0_13] : memref<128x512xbf16, #tpu.memory_space<vmem>>, vector<128x512xbf16>
    %cst_14 = arith.constant dense<0.000000e+00> : vector<8x512xf32>
    %17 = tpu.matmul %15, %16, %cst_14 {dimension_numbers = #tpu.dot_dimension_numbers<[1], [0], [0], [1], [0, 0, 1, 1], [], []>} : vector<8x128xbf16>, vector<128x512xbf16>, vector<8x512xf32> -> vector<8x512xf32>
    %c0_15 = arith.constant 0 : index
    %c0_16 = arith.constant 0 : index
    %18 = vector.load %arg7[%c0_15, %c0_16] : memref<1x512xf32, #tpu.memory_space<vmem>>, vector<1x512xf32>
    %19 = vector.broadcast %18 : vector<1x512xf32> to vector<8x512xf32>
    %20 = arith.addf %17, %19 : vector<8x512xf32>
    %21 = math.tanh %20 : vector<8x512xf32>
    %22 = arith.truncf %21 : vector<8x512xf32> to vector<8x512xbf16>
    %c0_17 = arith.constant 0 : index
    %c0_18 = arith.constant 0 : index
    %23 = vector.load %arg8[%c0_17, %c0_18] : memref<512x256xbf16, #tpu.memory_space<vmem>>, vector<512x256xbf16>
    %cst_19 = arith.constant dense<0.000000e+00> : vector<8x256xf32>
    %24 = tpu.matmul %22, %23, %cst_19 {dimension_numbers = #tpu.dot_dimension_numbers<[1], [0], [0], [1], [0, 0, 1, 1], [], []>} : vector<8x512xbf16>, vector<512x256xbf16>, vector<8x256xf32> -> vector<8x256xf32>
    %c0_20 = arith.constant 0 : index
    %c0_21 = arith.constant 0 : index
    %25 = vector.load %arg9[%c0_20, %c0_21] : memref<1x256xf32, #tpu.memory_space<vmem>>, vector<1x256xf32>
    %26 = vector.broadcast %25 : vector<1x256xf32> to vector<8x256xf32>
    %27 = arith.addf %24, %26 : vector<8x256xf32>
    %c0_22 = arith.constant 0 : index
    %c0_23 = arith.constant 0 : index
    %28 = vector.load %arg11[%c0_22, %c0_23] : memref<8x256xf32, #tpu.memory_space<vmem>>, vector<8x256xf32>
    tpu.vector_store %arg11[%c0_22, %c0_23], %27 {strides = array<i32>} : memref<8x256xf32, #tpu.memory_space<vmem>>, vector<8x256xf32>,
    return
  }
  func.func @transform_0(%arg0: i32) -> (i32, i32) {
    %c0_i32 = arith.constant 0 : i32
    %c0_i32_0 = arith.constant 0 : i32
    return %arg0, %c0_i32 : i32, i32
  }
  func.func @transform_1(%arg0: i32) -> (i32, i32) {
    %c0_i32 = arith.constant 0 : i32
    %c0_i32_0 = arith.constant 0 : i32
    %c0_i32_1 = arith.constant 0 : i32
    return %c0_i32, %c0_i32_0 : i32, i32
  }
  func.func @transform_2(%arg0: i32) -> (i32, i32) {
    %c0_i32 = arith.constant 0 : i32
    %c0_i32_0 = arith.constant 0 : i32
    %c0_i32_1 = arith.constant 0 : i32
    return %c0_i32, %c0_i32_0 : i32, i32
  }
  func.func @transform_3(%arg0: i32) -> (i32, i32) {
    %c0_i32 = arith.constant 0 : i32
    %c0_i32_0 = arith.constant 0 : i32
    %c0_i32_1 = arith.constant 0 : i32
    return %c0_i32, %c0_i32_0 : i32, i32
  }
  func.func @transform_4(%arg0: i32) -> (i32, i32) {
    %c0_i32 = arith.constant 0 : i32
    %c0_i32_0 = arith.constant 0 : i32
    %c0_i32_1 = arith.constant 0 : i32
    return %c0_i32, %c0_i32_0 : i32, i32
  }
  func.func @transform_5(%arg0: i32) -> (i32, i32) {
    %c0_i32 = arith.constant 0 : i32
    %c0_i32_0 = arith.constant 0 : i32
    %c0_i32_1 = arith.constant 0 : i32
    return %c0_i32, %c0_i32_0 : i32, i32
  }
  func.func @transform_6(%arg0: i32) -> (i32, i32) {
    %c0_i32 = arith.constant 0 : i32
    %c0_i32_0 = arith.constant 0 : i32
    %c0_i32_1 = arith.constant 0 : i32
    return %c0_i32, %c0_i32_0 : i32, i32
  }
  func.func @transform_7(%arg0: i32) -> (i32, i32) {
    %c0_i32 = arith.constant 0 : i32
    %c0_i32_0 = arith.constant 0 : i32
    %c0_i32_1 = arith.constant 0 : i32
    return %c0_i32, %c0_i32_0 : i32, i32
  }
  func.func @transform_8(%arg0: i32) -> (i32, i32) {
    %c0_i32 = arith.constant 0 : i32
    %c0_i32_0 = arith.constant 0 : i32
    %c0_i32_1 = arith.constant 0 : i32
    return %c0_i32, %c0_i32_0 : i32, i32
  }
  func.func @transform_9(%arg0: i32) -> (i32, i32) {
    %c0_i32 = arith.constant 0 : i32
    %c0_i32_0 = arith.constant 0 : i32
    return %arg0, %c0_i32 : i32, i32
  }
  func.func @transform_10(%arg0: i32) -> (i32, i32) {
    %c0_i32 = arith.constant 0 : i32
    %c0_i32_0 = arith.constant 0 : i32
    return %arg0, %c0_i32 : i32, i32
  }
}

</mosaic_0001>

<bundles_post_ra>
// kernel: autoencoder_forward.1
= control target key start
LH: loop header
LB: loop body
LE: loop exit
PB: predicated region body
PF: predicated region fallthrough
CT: control target
= control target key end

     0   :  { %16 = vsyncpa [#allocation3], 0  ;;  %s3104_s0 = inlined_call_operand.hbm [shape: f32[8,256], index: 0, kind: input, shape index: {}]   ;;  %s3105_s1 = inlined_call_operand.hbm [shape: bf16[256,512], index: 1, kind: input, shape index: {}]   ;;  %s3106_s2 = inlined_call_operand.hbm [shape: f32[1,512], index: 2, kind: input, shape index: {}]   ;;  %s3107_s3 = inlined_call_operand.hbm [shape: bf16[512,128], index: 3, kind: input, shape index: {}]   ;;  %s3108_s4 = inlined_call_operand.vmem [shape: f32[1,128], index: 4, kind: input, shape index: {}]   ;;  %s3109_s5 = inlined_call_operand.hbm [shape: bf16[128,512], index: 5, kind: input, shape index: {}]   ;;  %s3110_s6 = inlined_call_operand.hbm [shape: f32[1,512], index: 6, kind: input, shape index: {}]   ;;  %s3111_s7 = inlined_call_operand.hbm [shape: bf16[512,256], index: 7, kind: input, shape index: {}]   ;;  %s3112_s8 = inlined_call_operand.vmem [shape: f32[1,256], index: 8, kind: input, shape index: {}]   ;;  %s3113_s9 = inlined_call_operand.hbm [shape: f32[8,128], index: 9, kind: output, shape index: {0}]   ;;  %s3114_s10 = inlined_call_operand.hbm [shape: f32[8,256], index: 10, kind: output, shape index: {1}]  }
   0x1   :  { %17 = vsyncpa [#allocation6], 0 }
   0x2   :  { %18 = vsyncpa [#allocation9], 0 }
   0x3   :  { %19 = vsyncpa [#allocation12], 0 }
   0x4   :  { %20 = vsyncpa [#allocation4], 0  ;;  %s37_s15 = sshll.u32 %s3105_s1, 4  ;;  %s38_s15 = int_to_ptr.hbm [resolvable:$true] %s37_s15 }
   0x5   :  { %21 = vsyncpa [#allocation16], 0  ;;  %s2977_s16 = smov [#allocation5]   ;;  %s61_s20 = sshll.u32 %s3107_s3, 4  ;;  %s62_s20 = int_to_ptr.hbm [resolvable:$true] %s61_s20 }
   0x6   :  { %s39_s17 = sshll.u32 %s2977_s16, 4  ;;  %s2978_s21 = smov 256   ;;  %s40_s17 = int_to_ptr.vmem [resolvable:$true] %s39_s17 }
   0x7   :  { %s2979_s22 = smov 16   ;;  %s2980_s23 = smov [#allocation8]  }
   0x8   :  { %45 = dma.hbm_to_vmem [thread:$0]  %s38_s15, 8192, %s40_s17, [#allocation6], %s2978_s21, %s2978_s21, %s2979_s22  }
   0x9   :  { %s63_s24 = sshll.u32 %s2980_s23, 4  ;;  %s2981_s1 = smov 64   ;;  %s64_s24 = int_to_ptr.vmem [resolvable:$true] %s63_s24 }
   0xa   :  { %s2982_s25 = smov 4   ;;  %s90_s28 = sshll.u32 %s3110_s6, 4  ;;  %s91_s28 = int_to_ptr.hbm [resolvable:$true] %s90_s28 }
   0xb   :  { %69 = dma.hbm_to_vmem [thread:$0]  %s62_s20, 4096, %s64_s24, [#allocation9], %s2981_s1, %s2981_s1, %s2982_s25  }
   0xc   :  { %s2983_s29 = smov [#allocation11]   ;;  %s27_s12 = sshll.u32 %s3104_s0, 4  ;;  %s28_s12 = int_to_ptr.hbm [resolvable:$true] %s27_s12 }
   0xd   :  { %s92_s3 = sshll.u32 %s2983_s29, 4  ;;  %s2984_s13 = smov [#allocation2]   ;;  %s93_s3 = int_to_ptr.vmem [resolvable:$true] %s92_s3 }
   0xe   :  { %95 = dma.hbm_to_vmem [thread:$0]  %s91_s28, 64, %s93_s3, [#allocation12]  }
   0xf   :  { %s29_s14 = sshll.u32 %s2984_s13, 4  ;;  %s51_s17 = sshll.u32 %s3106_s2, 4  ;;  %s30_s14 = int_to_ptr.vmem [resolvable:$true] %s29_s14  ;;  %s52_s17 = int_to_ptr.hbm [resolvable:$true] %s51_s17 }
  0x10   :  { %32 = dma.hbm_to_vmem [thread:$0]  %s28_s12, 256, %s30_s14, [#allocation3]  }
  0x11   :  { %s76_s19 = sshll.u32 %s3109_s5, 4  ;;  %s2985_s20 = smov [#allocation7]   ;;  %s77_s19 = int_to_ptr.hbm [resolvable:$true] %s76_s19 }
  0x12   :  { %s53_s23 = sshll.u32 %s2985_s20, 4  ;;  %s2986_s0 = smov [#allocation10]   ;;  %s54_s23 = int_to_ptr.vmem [resolvable:$true] %s53_s23 }
  0x13   :  { %56 = dma.hbm_to_vmem [thread:$0]  %s52_s17, 64, %s54_s23, [#allocation6]  }
  0x14   :  { %s78_s24 = sshll.u32 %s2986_s0, 4  ;;  %s100_s26 = sshll.u32 %s3111_s7, 4  ;;  %s79_s24 = int_to_ptr.vmem [resolvable:$true] %s78_s24  ;;  %s101_s26 = int_to_ptr.hbm [resolvable:$true] %s100_s26 }
  0x15   :  { %84 = dma.hbm_to_vmem [thread:$0]  %s77_s19, 4096, %s79_s24, [#allocation9], %s2978_s21, %s2978_s21, %s2979_s22  }
  0x16   :  { %s2987_s2 = smov [#allocation13]   ;;  %s2988_s5 = smov 128  }
  0x17   :  { %s102_s27 = sshll.u32 %s2987_s2, 4  ;;  %s2989_s28 = smov 8   ;;  %s103_s27 = int_to_ptr.vmem [resolvable:$true] %s102_s27 }
  0x18   :  { %108 = dma.hbm_to_vmem [thread:$0]  %s101_s26, 8192, %s103_s27, [#allocation12], %s2988_s5, %s2988_s5, %s2989_s28  }
  0x19   :  { %2965 = dma.done.wait [#allocation3], 256  }
  0x1a   :  { %2966 = vsyncadd [#allocation3], 4294967040 }
  0x1b   :  { %2967 = dma.done.wait [#allocation6], 8256  }
  0x1c   :  { %2968 = vsyncadd [#allocation6], 4294959040 }
  0x1d   :  { %2969 = dma.done.wait [#allocation9], 8192  }
  0x1e   :  { %2970 = vsyncadd [#allocation9], 4294959104 }
  0x1f   :  { %2971 = dma.done.wait [#allocation12], 8256  }
  0x20   :  { %2972 = vsyncadd [#allocation12], 4294959040  ;;  %v1871_v0 = vld [vmem:[#allocation5 + $0xe0] sm:$0xf]  ;;  %v2555_v1 = vld [vmem:[#allocation5 + $0xec] sm:$0xf0] }
  0x21   :  { %v1999_v2 = vld [vmem:[#allocation5 + $0x1e0] sm:$0xf]  ;;  %v1872_v3 = vor.u32 %v2555_v1, %v1871_v0  ;;  %v2587_v4 = vld [vmem:[#allocation5 + $0x1ec] sm:$0xf0]  ;;  %v2553_v5 = vld [vmem:[#allocation5 + $0xe4] sm:$0xf] }
  0x22   :  { %v1873_v6 = vld [vmem:[#allocation5 + $0xf0] sm:$0xf0]  ;;  %v2000_v7 = vor.u32 %v2587_v4, %v1999_v2  ;;  %v2585_v9 = vld [vmem:[#allocation5 + $0x1e4] sm:$0xf]  ;;  %v1855_v11 = vld [vmem:[#allocation5 + $0xc0] sm:$0xf] }
  0x23   :  { %v1876_v8 = vor.u32 %v2553_v5, %v1873_v6  ;;  %v2001_v10 = vld [vmem:[#allocation5 + $0x1f0] sm:$0xf0]  ;;  %537 = vmatpush.bf16.msra.mxu0 %v1872_v3  ;;  %v2551_v13 = vld [vmem:[#allocation5 + $0xcc] sm:$0xf0]  ;;  %v1983_v14 = vld [vmem:[#allocation5 + $0x1c0] sm:$0xf] }
  0x24   :  { %v2004_v12 = vor.u32 %v2585_v9, %v2001_v10  ;;  %v2583_v15 = vld [vmem:[#allocation5 + $0x1cc] sm:$0xf0]  ;;  %550 = vmatpush.bf16.msra.mxu1 %v2000_v7  ;;  %v1856_v16 = vor.u32 %v2551_v13, %v1855_v11  ;;  %v2549_v18 = vld [vmem:[#allocation5 + $0xc4] sm:$0xf]  ;;  %v1857_v19 = vld [vmem:[#allocation5 + $0xd0] sm:$0xf0] }
  0x25   :  { %563 = vmatpush.bf16.msra.mxu2 %v1876_v8  ;;  %v1984_v17 = vor.u32 %v2583_v15, %v1983_v14  ;;  %v2581_v20 = vld [vmem:[#allocation5 + $0x1c4] sm:$0xf]  ;;  %v1860_v21 = vor.u32 %v2549_v18, %v1857_v19  ;;  %v1985_v22 = vld [vmem:[#allocation5 + $0x1d0] sm:$0xf0]  ;;  %v1839_v23 = vld [vmem:[#allocation5 + $0xa0] sm:$0xf] }
  0x26   :  { %576 = vmatpush.bf16.msra.mxu3 %v2004_v12  ;;  %v2547_v24 = vld [vmem:[#allocation5 + $0xac] sm:$0xf0]  ;;  %v1988_v25 = vor.u32 %v2581_v20, %v1985_v22  ;;  %v1967_v26 = vld [vmem:[#allocation5 + $0x1a0] sm:$0xf]  ;;  %v2545_v28 = vld [vmem:[#allocation5 + $0xa4] sm:$0xf] }
  0x27   :  { %v2579_v27 = vld [vmem:[#allocation5 + $0x1ac] sm:$0xf0]  ;;  %538 = vmatpush.bf16.msra.mxu0 %v1856_v16  ;;  %v1840_v29 = vor.u32 %v2547_v24, %v1839_v23  ;;  %v1841_v30 = vld [vmem:[#allocation5 + $0xb0] sm:$0xf0]  ;;  %v2577_v31 = vld [vmem:[#allocation5 + $0x1a4] sm:$0xf] }
  0x28   :  { %v1969_v32 = vld [vmem:[#allocation5 + $0x1b0] sm:$0xf0]  ;;  %551 = vmatpush.bf16.msra.mxu1 %v1984_v17  ;;  %v1968_v33 = vor.u32 %v2579_v27, %v1967_v26  ;;  %v1844_v34 = vor.u32 %v2545_v28, %v1841_v30  ;;  %v1823_v35 = vld [vmem:[#allocation5 + $0x80] sm:$0xf]  ;;  %v2543_v36 = vld [vmem:[#allocation5 + $0x8c] sm:$0xf0] }
  0x29   :  { %564 = vmatpush.bf16.msra.mxu2 %v1860_v21  ;;  %v1951_v37 = vld [vmem:[#allocation5 + $0x180] sm:$0xf]  ;;  %v1972_v38 = vor.u32 %v2577_v31, %v1969_v32  ;;  %v2575_v39 = vld [vmem:[#allocation5 + $0x18c] sm:$0xf0]  ;;  %v2541_v40 = vld [vmem:[#allocation5 + $0x84] sm:$0xf]  ;;  %v1824_v44 = vor.u32 %v2543_v36, %v1823_v35 }
  0x2a   :  { %577 = vmatpush.bf16.msra.mxu3 %v1988_v25  ;;  %v1825_v41 = vld [vmem:[#allocation5 + $0x90] sm:$0xf0]  ;;  %v2573_v42 = vld [vmem:[#allocation5 + $0x184] sm:$0xf]  ;;  %v1952_v45 = vor.u32 %v2575_v39, %v1951_v37  ;;  %v1807_v47 = vld [vmem:[#allocation5 + $0x60] sm:$0xf] }
  0x2b   :  { %v1953_v43 = vld [vmem:[#allocation5 + $0x190] sm:$0xf0]  ;;  %539 = vmatpush.bf16.msra.mxu0 %v1840_v29  ;;  %v1828_v46 = vor.u32 %v2541_v40, %v1825_v41  ;;  %v2539_v48 = vld [vmem:[#allocation5 + $0x6c] sm:$0xf0]  ;;  %v1935_v49 = vld [vmem:[#allocation5 + $0x160] sm:$0xf] }
  0x2c   :  { %552 = vmatpush.bf16.msra.mxu1 %v1968_v33  ;;  %v1956_v50 = vor.u32 %v2573_v42, %v1953_v43  ;;  %v2571_v51 = vld [vmem:[#allocation5 + $0x16c] sm:$0xf0]  ;;  %v2537_v52 = vld [vmem:[#allocation5 + $0x64] sm:$0xf]  ;;  %v1809_v53 = vld [vmem:[#allocation5 + $0x70] sm:$0xf0]  ;;  %v1808_v56 = vor.u32 %v2539_v48, %v1807_v47 }
  0x2d   :  { %565 = vmatpush.bf16.msra.mxu2 %v1844_v34  ;;  %v2569_v54 = vld [vmem:[#allocation5 + $0x164] sm:$0xf]  ;;  %v1937_v55 = vld [vmem:[#allocation5 + $0x170] sm:$0xf0]  ;;  %v1936_v57 = vor.u32 %v2571_v51, %v1935_v49  ;;  %v1812_v58 = vor.u32 %v2537_v52, %v1809_v53  ;;  %v1791_v59 = vld [vmem:[#allocation5 + $0x40] sm:$0xf] }
  0x2e   :  { %578 = vmatpush.bf16.msra.mxu3 %v1972_v38  ;;  %v2535_v60 = vld [vmem:[#allocation5 + $0x4c] sm:$0xf0]  ;;  %v1919_v61 = vld [vmem:[#allocation5 + $0x140] sm:$0xf]  ;;  %v1940_v62 = vor.u32 %v2569_v54, %v1937_v55  ;;  %v2533_v0 = vld [vmem:[#allocation5 + $0x44] sm:$0xf] }
  0x2f   :  { %540 = vmatpush.bf16.msra.mxu0 %v1824_v44  ;;  %v2567_v63 = vld [vmem:[#allocation5 + $0x14c] sm:$0xf0]  ;;  %v1793_v1 = vld [vmem:[#allocation5 + $0x50] sm:$0xf0]  ;;  %v2565_v2 = vld [vmem:[#allocation5 + $0x144] sm:$0xf]  ;;  %v1792_v4 = vor.u32 %v2535_v60, %v1791_v59 }
  0x30   :  { %553 = vmatpush.bf16.msra.mxu1 %v1952_v45  ;;  %v1921_v3 = vld [vmem:[#allocation5 + $0x150] sm:$0xf0]  ;;  %v1920_v5 = vor.u32 %v2567_v63, %v1919_v61  ;;  %v1796_v6 = vor.u32 %v2533_v0, %v1793_v1  ;;  %v1775_v7 = vld [vmem:[#allocation5 + $0x20] sm:$0xf]  ;;  %v2531_v8 = vld [vmem:[#allocation5 + $0x2c] sm:$0xf0] }
  0x31   :  { %566 = vmatpush.bf16.msra.mxu2 %v1828_v46  ;;  %v1903_v9 = vld [vmem:[#allocation5 + $0x120] sm:$0xf]  ;;  %v1924_v10 = vor.u32 %v2565_v2, %v1921_v3  ;;  %v2563_v11 = vld [vmem:[#allocation5 + $0x12c] sm:$0xf0]  ;;  %v2529_v12 = vld [vmem:[#allocation5 + $0x24] sm:$0xf]  ;;  %v1776_v16 = vor.u32 %v2531_v8, %v1775_v7 }
  0x32   :  { %579 = vmatpush.bf16.msra.mxu3 %v1956_v50  ;;  %v1777_v13 = vld [vmem:[#allocation5 + $0x30] sm:$0xf0]  ;;  %v2561_v14 = vld [vmem:[#allocation5 + $0x124] sm:$0xf]  ;;  %v1759_v17 = vld [vmem:[#allocation5] sm:$0xf]  ;;  %v1904_v19 = vor.u32 %v2563_v11, %v1903_v9 }
  0x33   :  { %541 = vmatpush.bf16.msra.mxu0 %v1808_v56  ;;  %v1905_v15 = vld [vmem:[#allocation5 + $0x130] sm:$0xf0]  ;;  %v2527_v18 = vld [vmem:[#allocation5 + $0xc] sm:$0xf0]  ;;  %v1780_v20 = vor.u32 %v2529_v12, %v1777_v13  ;;  %v1887_v21 = vld [vmem:[#allocation5 + $0x100] sm:$0xf] }
  0x34   :  { %554 = vmatpush.bf16.msra.mxu1 %v1936_v57  ;;  %v2559_v22 = vld [vmem:[#allocation5 + $0x10c] sm:$0xf0]  ;;  %v2525_v23 = vld [vmem:[#allocation5 + $0x4] sm:$0xf]  ;;  %v1908_v24 = vor.u32 %v2561_v14, %v1905_v15  ;;  %v1761_v25 = vld [vmem:[#allocation5 + $0x10] sm:$0xf0]  ;;  %v1760_v31 = vor.u32 %v2527_v18, %v1759_v17 }
  0x35   :  { %567 = vmatpush.bf16.msra.mxu2 %v1812_v58  ;;  %v2557_v26 = vld [vmem:[#allocation5 + $0x104] sm:$0xf]  ;;  %v1889_v27 = vld [vmem:[#allocation5 + $0x110] sm:$0xf0]  ;;  %v1879_v28 = vld [vmem:[#allocation5 + $0xe8] sm:$0xf]  ;;  %v1888_v35 = vor.u32 %v2559_v22, %v1887_v21  ;;  %v1764_v36 = vor.u32 %v2525_v23, %v1761_v25 }
  0x36   :  { %580 = vmatpush.bf16.msra.mxu3 %v1940_v62  ;;  %v2556_v29 = vld [vmem:[#allocation5 + $0xf4] sm:$0xf0]  ;;  %v2007_v30 = vld [vmem:[#allocation5 + $0x1e8] sm:$0xf]  ;;  %v2554_v33 = vld [vmem:[#allocation5 + $0xec] sm:$0xf]  ;;  %v1892_v40 = vor.u32 %v2557_v26, %v1889_v27 }
  0x37   :  { %542 = vmatpush.bf16.msra.mxu0 %v1792_v4  ;;  %v2588_v32 = vld [vmem:[#allocation5 + $0x1f4] sm:$0xf0]  ;;  %v1881_v34 = vld [vmem:[#allocation5 + $0xf8] sm:$0xf0]  ;;  %v2586_v37 = vld [vmem:[#allocation5 + $0x1ec] sm:$0xf]  ;;  %v1880_v41 = vor.u32 %v2556_v29, %v1879_v28 }
  0x38   :  { %555 = vmatpush.bf16.msra.mxu1 %v1920_v5  ;;  %v2009_v38 = vld [vmem:[#allocation5 + $0x1f8] sm:$0xf0]  ;;  %v139_v39 = vld [vmem:[#allocation2] sm:$0xff]  ;;  %v2008_v43 = vor.u32 %v2588_v32, %v2007_v30  ;;  %v1884_v44 = vor.u32 %v2554_v33, %v1881_v34  ;;  %v1863_v45 = vld [vmem:[#allocation5 + $0xc8] sm:$0xf]  ;;  %s1728_s30 = sshll.u32 %s3113_s9, 4  ;;  %s1729_s30 = int_to_ptr.hbm [resolvable:$true] %s1728_s30 }
  0x39   :  { %568 = vmatpush.bf16.msra.mxu2 %v1796_v6  ;;  %v140_v42 = vld [vmem:[#allocation2 + $0x8] sm:$0xff]  ;;  %v1991_v47 = vld [vmem:[#allocation5 + $0x1c8] sm:$0xf]  ;;  %v2012_v48 = vor.u32 %v2586_v37, %v2009_v38  ;;  %v2550_v50 = vld [vmem:[#allocation5 + $0xcc] sm:$0xf]  ;;  %v3074_v52 = vpack.c.bf16 %v139_v39, %v139_v39  ;;  %s1739_s15 = sshll.u32 %s3114_s10, 4  ;;  %s1740_s15 = int_to_ptr.hbm [resolvable:$true] %s1739_s15 }
  0x3a   :  { %581 = vmatpush.bf16.msra.mxu3 %v1924_v10  ;;  %v2552_v46 = vld [vmem:[#allocation5 + $0xd4] sm:$0xf0]  ;;  %v1865_v51 = vld [vmem:[#allocation5 + $0xd8] sm:$0xf0]  ;;  %v2582_v53 = vld [vmem:[#allocation5 + $0x1cc] sm:$0xf]  ;;  %v3076_v55 = vpack.c.bf16 %v140_v42, %v140_v42 }
  0x3b   :  { %543 = vmatpush.bf16.msra.mxu0 %v1776_v16  ;;  %v2584_v49 = vld [vmem:[#allocation5 + $0x1d4] sm:$0xf0]  ;;  %v1993_v54 = vld [vmem:[#allocation5 + $0x1d8] sm:$0xf0]  ;;  %v1864_v56 = vor.u32 %v2552_v46, %v1863_v45  ;;  %v1868_v58 = vor.u32 %v2550_v50, %v1865_v51  ;;  %v1847_v59 = vld [vmem:[#allocation5 + $0xa8] sm:$0xf] }
  0x3c   :  { %556 = vmatpush.bf16.msra.mxu1 %v1904_v19  ;;  %v1992_v57 = vor.u32 %v2584_v49, %v1991_v47  ;;  %v2548_v60 = vld [vmem:[#allocation5 + $0xb4] sm:$0xf0]  ;;  %v1975_v61 = vld [vmem:[#allocation5 + $0x1a8] sm:$0xf]  ;;  %v1996_v62 = vor.u32 %v2582_v53, %v1993_v54  ;;  %v2546_v0 = vld [vmem:[#allocation5 + $0xac] sm:$0xf] }
  0x3d   :  { %569 = vmatpush.bf16.msra.mxu2 %v1780_v20  ;;  %v2580_v63 = vld [vmem:[#allocation5 + $0x1b4] sm:$0xf0]  ;;  %v1849_v1 = vld [vmem:[#allocation5 + $0xb8] sm:$0xf0]  ;;  %v2578_v2 = vld [vmem:[#allocation5 + $0x1ac] sm:$0xf]  ;;  %v1848_v4 = vor.u32 %v2548_v60, %v1847_v59 }
  0x3e   :  { %582 = vmatpush.bf16.msra.mxu3 %v1908_v24  ;;  %v1977_v3 = vld [vmem:[#allocation5 + $0x1b8] sm:$0xf0]  ;;  %v1976_v5 = vor.u32 %v2580_v63, %v1975_v61  ;;  %v1852_v6 = vor.u32 %v2546_v0, %v1849_v1  ;;  %v1831_v7 = vld [vmem:[#allocation5 + $0x88] sm:$0xf]  ;;  %v2544_v8 = vld [vmem:[#allocation5 + $0x94] sm:$0xf0] }
  0x3f   :  { %544 = vmatpush.bf16.msra.mxu0 %v1760_v31  ;;  %v1959_v9 = vld [vmem:[#allocation5 + $0x188] sm:$0xf]  ;;  %v1980_v10 = vor.u32 %v2578_v2, %v1977_v3  ;;  %v2576_v11 = vld [vmem:[#allocation5 + $0x194] sm:$0xf0]  ;;  %v2542_v12 = vld [vmem:[#allocation5 + $0x8c] sm:$0xf]  ;;  %v1832_v16 = vor.u32 %v2544_v8, %v1831_v7 }
  0x40   :  { %557 = vmatpush.bf16.msra.mxu1 %v1888_v35  ;;  %v1833_v13 = vld [vmem:[#allocation5 + $0x98] sm:$0xf0]  ;;  %v2574_v14 = vld [vmem:[#allocation5 + $0x18c] sm:$0xf]  ;;  %v1960_v17 = vor.u32 %v2576_v11, %v1959_v9  ;;  %v1815_v19 = vld [vmem:[#allocation5 + $0x68] sm:$0xf] }
  0x41   :  { %570 = vmatpush.bf16.msra.mxu2 %v1764_v36  ;;  %v1961_v15 = vld [vmem:[#allocation5 + $0x198] sm:$0xf0]  ;;  %v1836_v18 = vor.u32 %v2542_v12, %v1833_v13  ;;  %v2540_v20 = vld [vmem:[#allocation5 + $0x74] sm:$0xf0]  ;;  %v1943_v21 = vld [vmem:[#allocation5 + $0x168] sm:$0xf] }
  0x42   :  { %583 = vmatpush.bf16.msra.mxu3 %v1892_v40  ;;  %545 = vmatmul.bf16.vlgmr.msra.gmra.mxu0 %v3074_v52  ;;  %v1964_v22 = vor.u32 %v2574_v14, %v1961_v15  ;;  %v2572_v23 = vld [vmem:[#allocation5 + $0x174] sm:$0xf0]  ;;  %v2538_v24 = vld [vmem:[#allocation5 + $0x6c] sm:$0xf]  ;;  %v1817_v25 = vld [vmem:[#allocation5 + $0x78] sm:$0xf0]  ;;  %v1816_v28 = vor.u32 %v2540_v20, %v1815_v19 }
  0x43   :  { %589 = vmatpush.bf16.msrb.mxu0 %v1880_v41  ;;  %558 = vmatmul.bf16.vlgmr.msra.gmra.mxu1 %v3076_v55  ;;  %v2570_v26 = vld [vmem:[#allocation5 + $0x16c] sm:$0xf]  ;;  %v1945_v27 = vld [vmem:[#allocation5 + $0x178] sm:$0xf0]  ;;  %v1799_v29 = vld [vmem:[#allocation5 + $0x48] sm:$0xf]  ;;  %v1944_v30 = vor.u32 %v2572_v23, %v1943_v21  ;;  %v1820_v31 = vor.u32 %v2538_v24, %v1817_v25 }
  0x44   :  { %602 = vmatpush.bf16.msrb.mxu1 %v2008_v43  ;;  %571 = vmatmul.bf16.vlgmr.msra.gmra.mxu2 %v3074_v52  ;;  %v2536_v32 = vld [vmem:[#allocation5 + $0x54] sm:$0xf0]  ;;  %v1927_v33 = vld [vmem:[#allocation5 + $0x148] sm:$0xf]  ;;  %v1948_v34 = vor.u32 %v2570_v26, %v1945_v27  ;;  %v2534_v36 = vld [vmem:[#allocation5 + $0x4c] sm:$0xf] }
  0x45   :  { %615 = vmatpush.bf16.msrb.mxu2 %v1884_v44  ;;  %584 = vmatmul.bf16.vlgmr.msra.gmra.mxu3 %v3076_v55  ;;  %v2568_v35 = vld [vmem:[#allocation5 + $0x154] sm:$0xf0]  ;;  %v1801_v37 = vld [vmem:[#allocation5 + $0x58] sm:$0xf0]  ;;  %v2566_v38 = vld [vmem:[#allocation5 + $0x14c] sm:$0xf]  ;;  %v1800_v40 = vor.u32 %v2536_v32, %v1799_v29 }
  0x46   :  { %628 = vmatpush.bf16.msrb.mxu3 %v2012_v48  ;;  %v1929_v39 = vld [vmem:[#allocation5 + $0x158] sm:$0xf0]  ;;  %v1928_v41 = vor.u32 %v2568_v35, %v1927_v33  ;;  %v1804_v42 = vor.u32 %v2534_v36, %v1801_v37  ;;  %v1783_v43 = vld [vmem:[#allocation5 + $0x28] sm:$0xf]  ;;  %v2532_v44 = vld [vmem:[#allocation5 + $0x34] sm:$0xf0] }
  0x47   :  { %590 = vmatpush.bf16.msrb.mxu0 %v1864_v56  ;;  %v1911_v45 = vld [vmem:[#allocation5 + $0x128] sm:$0xf]  ;;  %v1932_v46 = vor.u32 %v2566_v38, %v1929_v39  ;;  %v2564_v47 = vld [vmem:[#allocation5 + $0x134] sm:$0xf0]  ;;  %v2530_v48 = vld [vmem:[#allocation5 + $0x2c] sm:$0xf]  ;;  %v1784_v53 = vor.u32 %v2532_v44, %v1783_v43 }
  0x48   :  { %603 = vmatpush.bf16.msrb.mxu1 %v1992_v57  ;;  %v1785_v49 = vld [vmem:[#allocation5 + $0x38] sm:$0xf0]  ;;  %v2562_v50 = vld [vmem:[#allocation5 + $0x12c] sm:$0xf]  ;;  %v1912_v54 = vor.u32 %v2564_v47, %v1911_v45  ;;  %v1767_v57 = vld [vmem:[#allocation5 + $0x8] sm:$0xf] }
  0x49   :  { %616 = vmatpush.bf16.msrb.mxu2 %v1868_v58  ;;  %v1913_v51 = vld [vmem:[#allocation5 + $0x138] sm:$0xf0]  ;;  %v1788_v56 = vor.u32 %v2530_v48, %v1785_v49  ;;  %v2528_v58 = vld [vmem:[#allocation5 + $0x14] sm:$0xf0]  ;;  %v1895_v59 = vld [vmem:[#allocation5 + $0x108] sm:$0xf] }
  0x4a   :  { %629 = vmatpush.bf16.msrb.mxu3 %v1996_v62  ;;  %v1916_v60 = vor.u32 %v2562_v50, %v1913_v51  ;;  %v2560_v61 = vld [vmem:[#allocation5 + $0x114] sm:$0xf0]  ;;  %v2526_v62 = vld [vmem:[#allocation5 + $0xc] sm:$0xf]  ;;  %v1769_v63 = vld [vmem:[#allocation5 + $0x18] sm:$0xf0]  ;;  %v1768_v2 = vor.u32 %v2528_v58, %v1767_v57 }
  0x4b   :  { %591 = vmatpush.bf16.msrb.mxu0 %v1848_v4  ;;  %v2558_v0 = vld [vmem:[#allocation5 + $0x10c] sm:$0xf]  ;;  %v1897_v1 = vld [vmem:[#allocation5 + $0x118] sm:$0xf0]  ;;  %v1896_v3 = vor.u32 %v2560_v61, %v1895_v59  ;;  %v1772_v4 = vor.u32 %v2526_v62, %v1769_v63  ;;  %v2595_v8 = vld [vmem:[#allocation8 + $0x30] sm:$0xff] }
  0x4c   :  { %604 = vmatpush.bf16.msrb.mxu1 %v1976_v5  ;;  %v1900_v5 = vor.u32 %v2558_v0, %v1897_v1  ;;  %v2604_v7 = vld [vmem:[#allocation8 + $0x78] sm:$0xff]  ;;  %v2603_v9 = vld [vmem:[#allocation8 + $0x70] sm:$0xff]  ;;  %v2602_v11 = vld [vmem:[#allocation8 + $0x68] sm:$0xff] }
  0x4d   :  { %617 = vmatpush.bf16.msrb.mxu2 %v1852_v6  ;;  %v2596_v6 = vld [vmem:[#allocation8 + $0x38] sm:$0xff]  ;;  %v2593_v12 = vld [vmem:[#allocation8 + $0x20] sm:$0xff]  ;;  %v2598_v19 = vld [vmem:[#allocation8 + $0x48] sm:$0xff] }
  0x4e   :  { %630 = vmatpush.bf16.msrb.mxu3 %v1980_v10  ;;  %v2594_v10 = vld [vmem:[#allocation8 + $0x28] sm:$0xff]  ;;  %v2601_v13 = vld [vmem:[#allocation8 + $0x60] sm:$0xff]  ;;  %v2592_v14 = vld [vmem:[#allocation8 + $0x18] sm:$0xff] }
  0x4f   :  { %592 = vmatpush.bf16.msrb.mxu0 %v1832_v16  ;;  %v2600_v15 = vld [vmem:[#allocation8 + $0x58] sm:$0xff]  ;;  %v2591_v16 = vld [vmem:[#allocation8 + $0x10] sm:$0xff]  ;;  %v2589_v21 = vld [vmem:[#allocation8] sm:$0xff] }
  0x50   :  { %605 = vmatpush.bf16.msrb.mxu1 %v1960_v17  ;;  %v2612_v17 = vld [vmem:[#allocation8 + $0xb8] sm:$0xff]  ;;  %v2597_v23 = vld [vmem:[#allocation8 + $0x40] sm:$0xff]  ;;  %v2619_v24 = vld [vmem:[#allocation8 + $0xf0] sm:$0xff] }
  0x51   :  { %618 = vmatpush.bf16.msrb.mxu2 %v1836_v18  ;;  %v2611_v18 = vld [vmem:[#allocation8 + $0xb0] sm:$0xff]  ;;  %v2620_v20 = vld [vmem:[#allocation8 + $0xf8] sm:$0xff]  ;;  %v2609_v25 = vld [vmem:[#allocation8 + $0xa0] sm:$0xff] }
  0x52   :  { %631 = vmatpush.bf16.msrb.mxu3 %v1964_v22  ;;  %v2610_v22 = vld [vmem:[#allocation8 + $0xa8] sm:$0xff]  ;;  %v2608_v27 = vld [vmem:[#allocation8 + $0x98] sm:$0xff]  ;;  %v2605_v43 = vld [vmem:[#allocation8 + $0x80] sm:$0xff] }
  0x53   :  { %593 = vmatpush.bf16.msrb.mxu0 %v1816_v28  ;;  %v2618_v26 = vld [vmem:[#allocation8 + $0xe8] sm:$0xff]  ;;  %v207_v28 = vld [vmem:[#allocation7] sm:$0xf]  ;;  %v2613_v51 = vld [vmem:[#allocation8 + $0xc0] sm:$0xff] }
  0x54   :  { %606 = vmatpush.bf16.msrb.mxu1 %v1944_v30  ;;  %v209_v29 = vperm.slane %v207_v28, 0  ;;  %v2617_v30 = vld [vmem:[#allocation8 + $0xe0] sm:$0xff]  ;;  %v2616_v35 = vld [vmem:[#allocation8 + $0xd8] sm:$0xff]  ;;  %v210_v36 = vperm.slane %v207_v28, 1  ;;  %v2606_v38 = vld [vmem:[#allocation8 + $0x88] sm:$0xff]  ;;  %v211_v57 = vperm.slane %v207_v28, 2 }
  0x55   :  { %619 = vmatpush.bf16.msrb.mxu2 %v1820_v31  ;;  %v2607_v31 = vld [vmem:[#allocation8 + $0x90] sm:$0xff]  ;;  %v2614_v47 = vld [vmem:[#allocation8 + $0xc8] sm:$0xff]  ;;  %v212_v62 = vperm.slane %v207_v28, 3 }
  0x56   :  { %632 = vmatpush.bf16.msrb.mxu3 %v1948_v34 }
  0x57   :  { %594 = vmatpush.bf16.msrb.mxu0 %v1800_v40  ;;  %v2615_v40 = vld [vmem:[#allocation8 + $0xd0] sm:$0xff] }
  0x58   :  { %607 = vmatpush.bf16.msrb.mxu1 %v1928_v41 }
  0x59   :  { %620 = vmatpush.bf16.msrb.mxu2 %v1804_v42 }
  0x5a   :  { %633 = vmatpush.bf16.msrb.mxu3 %v1932_v46 }
  0x5b   :  { %595 = vmatpush.bf16.msrb.mxu0 %v1784_v53 }
  0x5c   :  { %608 = vmatpush.bf16.msrb.mxu1 %v1912_v54 }
  0x5d   :  { %621 = vmatpush.bf16.msrb.mxu2 %v1788_v56 }
  0x5e   :  { %634 = vmatpush.bf16.msrb.mxu3 %v1916_v60 }
  0x5f   :  { %596 = vmatpush.bf16.msrb.mxu0 %v1768_v2 }
  0x60   :  { %609 = vmatpush.bf16.msrb.mxu1 %v1896_v3 }
  0x61   :  { %622 = vmatpush.bf16.msrb.mxu2 %v1772_v4 }
  0x62   :  { %635 = vmatpush.bf16.msrb.mxu3 %v1900_v5  ;;  %597 = vmatmul.bf16.vlgmr.msrb.gmra.mxu0 %v3074_v52 }
  0x63   :  { %909 = vmatpush.bf16.msra.mxu0 %v2596_v6  ;;  %610 = vmatmul.bf16.vlgmr.msrb.gmra.mxu1 %v3076_v55 }
  0x64   :  { %922 = vmatpush.bf16.msra.mxu1 %v2604_v7  ;;  %623 = vmatmul.bf16.vlgmr.msrb.gmra.mxu2 %v3074_v52  ;;  %v2599_v52 = vld [vmem:[#allocation8 + $0x50] sm:$0xff] }
  0x65   :  { %636 = vmatmul.bf16.vlgmr.msrb.gmra.mxu3 %v3076_v55  ;;  %935 = vmatpush.bf16.msra.mxu2 %v2612_v17  ;;  %v2590_v55 = vld [vmem:[#allocation8 + $0x8] sm:$0xff]  ;;  %v2652_v17 = vld [vmem:[#allocation10 + $0xf4] sm:$0xf0] }
  0x66   :  { %948 = vmatpush.bf16.msra.mxu3 %v2620_v20 }
  0x67   :  { %910 = vmatpush.bf16.msra.mxu0 %v2595_v8 }
  0x68   :  { %923 = vmatpush.bf16.msra.mxu1 %v2603_v9 }
  0x69   :  { %936 = vmatpush.bf16.msra.mxu2 %v2611_v18  ;;  %v2650_v18 = vld [vmem:[#allocation10 + $0xec] sm:$0xf] }
  0x6a   :  { %949 = vmatpush.bf16.msra.mxu3 %v2619_v24 }
  0x6b   :  { %911 = vmatpush.bf16.msra.mxu0 %v2594_v10 }
  0x6c   :  { %924 = vmatpush.bf16.msra.mxu1 %v2602_v11  ;;  %v2255_v11 = vld [vmem:[#allocation10 + $0xe0] sm:$0xf] }
  0x6d   :  { %937 = vmatpush.bf16.msra.mxu2 %v2610_v22  ;;  %v2647_v22 = vld [vmem:[#allocation10 + $0xcc] sm:$0xf0] }
  0x6e   :  { %950 = vmatpush.bf16.msra.mxu3 %v2618_v26  ;;  %v2247_v26 = vld [vmem:[#allocation10 + $0xc8] sm:$0xf] }
  0x6f   :  { %912 = vmatpush.bf16.msra.mxu0 %v2593_v12  ;;  %v2651_v12 = vld [vmem:[#allocation10 + $0xec] sm:$0xf0] }
  0x70   :  { %925 = vmatpush.bf16.msra.mxu1 %v2601_v13  ;;  %v2649_v13 = vld [vmem:[#allocation10 + $0xe4] sm:$0xf] }
  0x71   :  { %938 = vmatpush.bf16.msra.mxu2 %v2609_v25  ;;  %v2241_v25 = vld [vmem:[#allocation10 + $0xd0] sm:$0xf0] }
  0x72   :  { %951 = vmatpush.bf16.msra.mxu3 %v2617_v30  ;;  %v2646_v30 = vld [vmem:[#allocation10 + $0xcc] sm:$0xf] }
  0x73   :  { %913 = vmatpush.bf16.msra.mxu0 %v2592_v14  ;;  %v2256_v14 = vor.u32 %v2651_v12, %v2255_v11  ;;  %v2177_v12 = vld [vmem:[#allocation10 + $0x50] sm:$0xf0] }
  0x74   :  { %926 = vmatpush.bf16.msra.mxu1 %v2600_v15  ;;  %v2257_v15 = vld [vmem:[#allocation10 + $0xf0] sm:$0xf0] }
  0x75   :  { %939 = vmatpush.bf16.msra.mxu2 %v2608_v27  ;;  %v2648_v27 = vld [vmem:[#allocation10 + $0xd4] sm:$0xf0] }
  0x76   :  { %952 = vmatpush.bf16.msra.mxu3 %v2616_v35  ;;  %v2641_v35 = vld [vmem:[#allocation10 + $0xa4] sm:$0xf] }
  0x77   :  { %914 = vmatpush.bf16.msra.mxu0 %v2591_v16  ;;  %v2263_v16 = vld [vmem:[#allocation10 + $0xe8] sm:$0xf] }
  0x78   :  { %927 = vmatpush.bf16.msra.mxu1 %v2599_v52  ;;  %v2260_v52 = vor.u32 %v2649_v13, %v2257_v15  ;;  %v2183_v13 = vld [vmem:[#allocation10 + $0x48] sm:$0xf] }
  0x79   :  { %940 = vmatpush.bf16.msra.mxu2 %v2607_v31  ;;  %v2249_v31 = vld [vmem:[#allocation10 + $0xd8] sm:$0xf0] }
  0x7a   :  { %953 = vmatpush.bf16.msra.mxu3 %v2615_v40  ;;  %v2644_v40 = vld [vmem:[#allocation10 + $0xb4] sm:$0xf0] }
  0x7b   :  { %915 = vmatpush.bf16.msra.mxu0 %v2590_v55  ;;  %v2264_v55 = vor.u32 %v2652_v17, %v2263_v16  ;;  %v2630_v17 = vld [vmem:[#allocation10 + $0x4c] sm:$0xf] }
  0x7c   :  { %928 = vmatpush.bf16.msra.mxu1 %v2598_v19  ;;  %v2265_v19 = vld [vmem:[#allocation10 + $0xf8] sm:$0xf0] }
  0x7d   :  { %941 = vmatpush.bf16.msra.mxu2 %v2606_v38  ;;  %v2268_v20 = vor.u32 %v2650_v18, %v2265_v19  ;;  %v2627_v19 = vld [vmem:[#allocation10 + $0x2c] sm:$0xf0] }
  0x7e   :  { %954 = vmatpush.bf16.msra.mxu3 %v2614_v47  ;;  %v2637_v47 = vld [vmem:[#allocation10 + $0x84] sm:$0xf] }
  0x7f   :  { %916 = vmatpush.bf16.msra.mxu0 %v2589_v21  ;;  %v2239_v21 = vld [vmem:[#allocation10 + $0xc0] sm:$0xf] }
  0x80   :  { %929 = vmatpush.bf16.msra.mxu1 %v2597_v23  ;;  %v2645_v23 = vld [vmem:[#allocation10 + $0xc4] sm:$0xf]  ;;  %v2240_v24 = vor.u32 %v2647_v22, %v2239_v21  ;;  %v2161_v21 = vld [vmem:[#allocation10 + $0x30] sm:$0xf0] }
  0x81   :  { %942 = vmatpush.bf16.msra.mxu2 %v2605_v43  ;;  %v2244_v28 = vor.u32 %v2645_v23, %v2241_v25  ;;  %v2233_v43 = vld [vmem:[#allocation10 + $0xb8] sm:$0xf0]  ;;  %v2167_v25 = vld [vmem:[#allocation10 + $0x28] sm:$0xf] }
  0x82   :  { %955 = vmatpush.bf16.msra.mxu3 %v2613_v51  ;;  %v2640_v51 = vld [vmem:[#allocation10 + $0x94] sm:$0xf0] }
  0x83   :  { %1165 = vmatpush.bf16.msrb.mxu0 %v2256_v14  ;;  %v2632_v14 = vld [vmem:[#allocation10 + $0x54] sm:$0xf0] }
  0x84   :  { %1178 = vmatpush.bf16.msrb.mxu1 %v2260_v52  ;;  %v2184_v16 = vor.u32 %v2632_v14, %v2183_v13  ;;  %v2185_v52 = vld [vmem:[#allocation10 + $0x58] sm:$0xf0]  ;;  %v2303_v13 = vld [vmem:[#allocation13 + $0x40] sm:$0xf]  ;;  %v2662_v14 = vld [vmem:[#allocation13 + $0x44] sm:$0xf0] }
  0x85   :  { %1191 = vmatpush.bf16.msrb.mxu2 %v2264_v55  ;;  %v2159_v55 = vld [vmem:[#allocation10 + $0x20] sm:$0xf]  ;;  %v2188_v18 = vor.u32 %v2630_v17, %v2185_v52  ;;  %v2696_v17 = vld [vmem:[#allocation13 + $0x154] sm:$0xf0]  ;;  %v2503_v52 = vld [vmem:[#allocation13 + $0x1d0] sm:$0xf] }
  0x86   :  { %1204 = vmatpush.bf16.msrb.mxu3 %v2268_v20  ;;  %v2625_v20 = vld [vmem:[#allocation10 + $0x24] sm:$0xf]  ;;  %v2160_v23 = vor.u32 %v2627_v19, %v2159_v55  ;;  %v2712_v19 = vld [vmem:[#allocation13 + $0x1d4] sm:$0xf0] }
  0x87   :  { %1166 = vmatpush.bf16.msrb.mxu0 %v2240_v24  ;;  %v2164_v24 = vor.u32 %v2625_v20, %v2161_v21  ;;  %v2367_v55 = vld [vmem:[#allocation13 + $0xc0] sm:$0xf]  ;;  %v2504_v21 = vor.u32 %v2712_v19, %v2503_v52 }
  0x88   :  { %1179 = vmatpush.bf16.msrb.mxu1 %v2244_v28 }
  0xbf   :  { %v546_v32 = vpop.f32.mrf.mxu0 }
  0xc0   :  { %v547_v33 = vadd.f32 %v546_v32, %v209_v29  ;;  %v559_v34 = vpop.f32.mrf.mxu1  ;;  %v2248_v29 = vor.u32 %v2648_v27, %v2247_v26  ;;  %v2223_v32 = vld [vmem:[#allocation10 + $0xa0] sm:$0xf]  ;;  %v2628_v26 = vld [vmem:[#allocation10 + $0x34] sm:$0xf0]  ;;  %v2626_v27 = vld [vmem:[#allocation10 + $0x2c] sm:$0xf] }
  0xc1   :  { %v2168_v28 = vor.u32 %v2628_v26, %v2167_v25  ;;  %v2694_v25 = vld [vmem:[#allocation13 + $0x144] sm:$0xf0]  ;;  %v2495_v26 = vld [vmem:[#allocation13 + $0x1c0] sm:$0xf] }
  0xc2   :  { %v560_v37 = vadd.f32 %v559_v34, %v547_v33  ;;  %v2252_v33 = vor.u32 %v2646_v30, %v2249_v31  ;;  %v2643_v34 = vld [vmem:[#allocation10 + $0xac] sm:$0xf0]  ;;  %1192 = vmatpush.bf16.msrb.mxu2 %v2248_v29  ;;  %v2169_v29 = vld [vmem:[#allocation10 + $0x38] sm:$0xf0] }
  0xc3   :  { %v2172_v30 = vor.u32 %v2626_v27, %v2169_v29  ;;  %v2710_v27 = vld [vmem:[#allocation13 + $0x1c4] sm:$0xf0]  ;;  %v2295_v29 = vld [vmem:[#allocation13 + $0x30] sm:$0xf] }
  0xc4   :  { %2733 = vtanh.f32 %v560_v37  ;;  %v2224_v37 = vor.u32 %v2643_v34, %v2223_v32  ;;  %1205 = vmatpush.bf16.msrb.mxu3 %v2252_v33  ;;  %v2143_v32 = vld [vmem:[#allocation10] sm:$0xf]  ;;  %v2623_v33 = vld [vmem:[#allocation10 + $0xc] sm:$0xf0]  ;;  %v2621_v34 = vld [vmem:[#allocation10 + $0x4] sm:$0xf] }
  0xc6   :  { %1167 = vmatpush.bf16.msrb.mxu0 %v2224_v37  ;;  %v2151_v37 = vld [vmem:[#allocation10 + $0x8] sm:$0xf] }
  0xc7   :  { %v572_v39 = vpop.f32.mrf.mxu2  ;;  %v548_v45 = vpop.f32.mrf.mxu0 }
  0xc8   :  { %v573_v41 = vadd.f32 %v572_v39, %v210_v36  ;;  %v585_v42 = vpop.f32.mrf.mxu3  ;;  %v561_v46 = vpop.f32.mrf.mxu1  ;;  %v2225_v36 = vld [vmem:[#allocation10 + $0xb0] sm:$0xf0]  ;;  %v2231_v39 = vld [vmem:[#allocation10 + $0xa8] sm:$0xf]  ;;  %v2639_v45 = vld [vmem:[#allocation10 + $0x8c] sm:$0xf0] }
  0xc9   :  { %v2228_v38 = vor.u32 %v2641_v35, %v2225_v36  ;;  %v2144_v35 = vor.u32 %v2623_v33, %v2143_v32  ;;  %v2145_v36 = vld [vmem:[#allocation10 + $0x10] sm:$0xf0]  ;;  %v2676_v33 = vld [vmem:[#allocation13 + $0xb4] sm:$0xf0] }
  0xca   :  { %v586_v44 = vadd.f32 %v585_v42, %v573_v41  ;;  %v2734_v48 = vpop.eup %2733  ;;  %v2642_v41 = vld [vmem:[#allocation10 + $0xac] sm:$0xf]  ;;  %v2232_v42 = vor.u32 %v2644_v40, %v2231_v39  ;;  %v2148_v39 = vor.u32 %v2621_v34, %v2145_v36  ;;  %v2359_v32 = vld [vmem:[#allocation13 + $0xb0] sm:$0xf] }
  0xcb   :  { %v645_v49 = vpack.c.bf16 %v2734_v48, %v2734_v48  ;;  %v2236_v46 = vor.u32 %v2642_v41, %v2233_v43  ;;  %v2209_v48 = vld [vmem:[#allocation10 + $0x90] sm:$0xf0]  ;;  %1180 = vmatpush.bf16.msrb.mxu1 %v2228_v38  ;;  %v2624_v38 = vld [vmem:[#allocation10 + $0x14] sm:$0xf0]  ;;  %v2622_v41 = vld [vmem:[#allocation10 + $0xc] sm:$0xf] }
  0xcc   :  { %2735 = vtanh.f32 %v586_v44  ;;  %v2207_v44 = vld [vmem:[#allocation10 + $0x80] sm:$0xf]  ;;  %1193 = vmatpush.bf16.msrb.mxu2 %v2232_v42  ;;  %v2152_v40 = vor.u32 %v2624_v38, %v2151_v37  ;;  %v2153_v42 = vld [vmem:[#allocation10 + $0x18] sm:$0xf0]  ;;  %v2423_v36 = vld [vmem:[#allocation13 + $0x130] sm:$0xf] }
  0xcd   :  { %917 = vmatmul.bf16.vlgmr.msra.gmra.mxu0 %v645_v49  ;;  %v2215_v49 = vld [vmem:[#allocation10 + $0x88] sm:$0xf]  ;;  %1206 = vmatpush.bf16.msrb.mxu3 %v2236_v46  ;;  %v2156_v43 = vor.u32 %v2622_v41, %v2153_v42  ;;  %v2668_v46 = vld [vmem:[#allocation13 + $0x74] sm:$0xf0]  ;;  %v2360_v41 = vor.u32 %v2676_v33, %v2359_v32  ;;  %v2287_v42 = vld [vmem:[#allocation13 + $0x20] sm:$0xf] }
  0xce   :  { %v2692_v38 = vld [vmem:[#allocation13 + $0x134] sm:$0xf0]  ;;  %v2686_v32 = vld [vmem:[#allocation13 + $0x104] sm:$0xf0]  ;;  %v2463_v33 = vld [vmem:[#allocation13 + $0x180] sm:$0xf] }
  0xcf   :  { %v574_v50 = vpop.f32.mrf.mxu2 }
  0xd0   :  { %v587_v53 = vpop.f32.mrf.mxu3  ;;  %v2208_v50 = vor.u32 %v2639_v45, %v2207_v44  ;;  %v2327_v45 = vld [vmem:[#allocation13 + $0x70] sm:$0xf] }
  0xd1   :  { %v2638_v53 = vld [vmem:[#allocation10 + $0x8c] sm:$0xf] }
  0xd2   :  { %v2736_v54 = vpop.eup %2735  ;;  %1168 = vmatpush.bf16.msrb.mxu0 %v2208_v50  ;;  %v2319_v50 = vld [vmem:[#allocation13 + $0x60] sm:$0xf] }
  0xd3   :  { %v646_v56 = vpack.c.bf16 %v2736_v54, %v2736_v54  ;;  %v2217_v54 = vld [vmem:[#allocation10 + $0x98] sm:$0xf0] }
  0xd5   :  { %930 = vmatmul.bf16.vlgmr.msra.gmra.mxu1 %v646_v56  ;;  %v2212_v56 = vor.u32 %v2637_v47, %v2209_v48  ;;  %v2391_v47 = vld [vmem:[#allocation13 + $0xf0] sm:$0xf]  ;;  %v2328_v48 = vor.u32 %v2668_v46, %v2327_v45  ;;  %v2351_v46 = vld [vmem:[#allocation13 + $0xa0] sm:$0xf] }
  0xd7   :  { %1181 = vmatpush.bf16.msrb.mxu1 %v2212_v56  ;;  %v2682_v56 = vld [vmem:[#allocation13 + $0xe4] sm:$0xf0] }
  0xdf   :  { %v598_v58 = vpop.f32.mrf.mxu0 }
  0xe0   :  { %v599_v59 = vadd.f32 %v598_v58, %v211_v57  ;;  %v611_v60 = vpop.f32.mrf.mxu1  ;;  %v2216_v57 = vor.u32 %v2640_v51, %v2215_v49  ;;  %v2191_v58 = vld [vmem:[#allocation10 + $0x60] sm:$0xf]  ;;  %v2684_v49 = vld [vmem:[#allocation13 + $0xf4] sm:$0xf0]  ;;  %v2666_v51 = vld [vmem:[#allocation13 + $0x64] sm:$0xf0] }
  0xe2   :  { %v612_v61 = vadd.f32 %v611_v60, %v599_v59  ;;  %v2635_v59 = vld [vmem:[#allocation10 + $0x6c] sm:$0xf0]  ;;  %v2633_v60 = vld [vmem:[#allocation10 + $0x64] sm:$0xf]  ;;  %1194 = vmatpush.bf16.msrb.mxu2 %v2216_v57  ;;  %v2455_v57 = vld [vmem:[#allocation13 + $0x170] sm:$0xf] }
  0xe4   :  { %2737 = vtanh.f32 %v612_v61  ;;  %v2220_v61 = vor.u32 %v2638_v53, %v2217_v54  ;;  %v2392_v53 = vor.u32 %v2684_v49, %v2391_v47  ;;  %v2383_v54 = vld [vmem:[#allocation13 + $0xe0] sm:$0xf]  ;;  %v2674_v47 = vld [vmem:[#allocation13 + $0xa4] sm:$0xf0] }
  0xe6   :  { %1207 = vmatpush.bf16.msrb.mxu3 %v2220_v61  ;;  %v2716_v61 = vld [vmem:[#allocation13 + $0x1f4] sm:$0xf0] }
  0xe7   :  { %v624_v63 = vpop.f32.mrf.mxu2  ;;  %v600_v2 = vpop.f32.mrf.mxu0 }
  0xe8   :  { %v625_v0 = vadd.f32 %v624_v63, %v212_v62  ;;  %v637_v1 = vpop.f32.mrf.mxu3  ;;  %v613_v3 = vpop.f32.mrf.mxu1  ;;  %v2193_v62 = vld [vmem:[#allocation10 + $0x70] sm:$0xf0]  ;;  %v2199_v63 = vld [vmem:[#allocation10 + $0x68] sm:$0xf]  ;;  %v2201_v2 = vld [vmem:[#allocation10 + $0x78] sm:$0xf0] }
  0xe9   :  { %v2192_v3 = vor.u32 %v2635_v59, %v2191_v58  ;;  %v2320_v58 = vor.u32 %v2666_v51, %v2319_v50  ;;  %v2700_v59 = vld [vmem:[#allocation13 + $0x174] sm:$0xf0]  ;;  %v2415_v50 = vld [vmem:[#allocation13 + $0x120] sm:$0xf] }
  0xea   :  { %v638_v4 = vadd.f32 %v637_v1, %v625_v0  ;;  %v2738_v5 = vpop.eup %2737  ;;  %v2636_v0 = vld [vmem:[#allocation10 + $0x74] sm:$0xf0]  ;;  %v2634_v1 = vld [vmem:[#allocation10 + $0x6c] sm:$0xf] }
  0xeb   :  { %v647_v6 = vpack.c.bf16 %v2738_v5, %v2738_v5  ;;  %v2200_v5 = vor.u32 %v2636_v0, %v2199_v63  ;;  %1169 = vmatpush.bf16.msrb.mxu0 %v2192_v3  ;;  %v2456_v63 = vor.u32 %v2700_v59, %v2455_v57  ;;  %v2375_v3 = vld [vmem:[#allocation13 + $0xd0] sm:$0xf]  ;;  %v2352_v57 = vor.u32 %v2674_v47, %v2351_v46  ;;  %v2656_v59 = vld [vmem:[#allocation13 + $0x14] sm:$0xf0]  ;;  %v2679_v46 = vld [vmem:[#allocation13 + $0xd4] sm:$0xf] }
  0xec   :  { %2739 = vtanh.f32 %v638_v4  ;;  %v2196_v4 = vor.u32 %v2633_v60, %v2193_v62  ;;  %v2519_v60 = vld [vmem:[#allocation13 + $0x1f0] sm:$0xf]  ;;  %v2384_v62 = vor.u32 %v2682_v56, %v2383_v54  ;;  %v2479_v54 = vld [vmem:[#allocation13 + $0x1a0] sm:$0xf]  ;;  %v2706_v56 = vld [vmem:[#allocation13 + $0x1a4] sm:$0xf0] }
  0xed   :  { %943 = vmatmul.bf16.vlgmr.msra.gmra.mxu2 %v647_v6  ;;  %v2204_v6 = vor.u32 %v2634_v1, %v2201_v2  ;;  %v2520_v0 = vor.u32 %v2716_v61, %v2519_v60  ;;  %v2311_v1 = vld [vmem:[#allocation13 + $0x50] sm:$0xf]  ;;  %v2664_v2 = vld [vmem:[#allocation13 + $0x54] sm:$0xf0]  ;;  %v2377_v47 = vld [vmem:[#allocation13 + $0xd8] sm:$0xf0] }
  0xee   :  { %1182 = vmatpush.bf16.msrb.mxu1 %v2196_v4  ;;  %1195 = vmatpush.bf16.msrb.mxu2 %v2200_v5  ;;  %v2680_v4 = vld [vmem:[#allocation13 + $0xd4] sm:$0xf0]  ;;  %v2447_v5 = vld [vmem:[#allocation13 + $0x160] sm:$0xf] }
  0xef   :  { %v626_v7 = vpop.f32.mrf.mxu2  ;;  %1208 = vmatpush.bf16.msrb.mxu3 %v2204_v6  ;;  %v2698_v6 = vld [vmem:[#allocation13 + $0x164] sm:$0xf0]  ;;  %v2672_v61 = vld [vmem:[#allocation13 + $0x94] sm:$0xf0] }
  0xf0   :  { %v639_v8 = vpop.f32.mrf.mxu3 }
  0xf1   :  { %v2175_v8 = vld [vmem:[#allocation10 + $0x40] sm:$0xf] }
  0xf2   :  { %v2740_v9 = vpop.eup %2739  ;;  %1196 = vmatpush.bf16.msrb.mxu2 %v2184_v16  ;;  %v2439_v16 = vld [vmem:[#allocation13 + $0x150] sm:$0xf] }
  0xf3   :  { %v648_v10 = vpack.c.bf16 %v2740_v9, %v2740_v9  ;;  %v2631_v9 = vld [vmem:[#allocation10 + $0x4c] sm:$0xf0]  ;;  %1209 = vmatpush.bf16.msrb.mxu3 %v2188_v18  ;;  %v2678_v18 = vld [vmem:[#allocation13 + $0xc4] sm:$0xf0]  ;;  %v2440_v20 = vor.u32 %v2696_v17, %v2439_v16  ;;  %v2471_v16 = vld [vmem:[#allocation13 + $0x190] sm:$0xf] }
  0xf4   :  { %v2176_v11 = vor.u32 %v2631_v9, %v2175_v8  ;;  %v2448_v8 = vor.u32 %v2698_v6, %v2447_v5  ;;  %v2511_v9 = vld [vmem:[#allocation13 + $0x1e0] sm:$0xf]  ;;  %v2704_v17 = vld [vmem:[#allocation13 + $0x194] sm:$0xf0] }
  0xf5   :  { %956 = vmatmul.bf16.vlgmr.msra.gmra.mxu3 %v648_v10  ;;  %v2629_v10 = vld [vmem:[#allocation10 + $0x44] sm:$0xf] }
  0xf6   :  { %v2180_v15 = vor.u32 %v2629_v10, %v2177_v12  ;;  %1170 = vmatpush.bf16.msrb.mxu0 %v2176_v11  ;;  %1197 = vmatpush.bf16.msrb.mxu2 %v2168_v28  ;;  %v2714_v10 = vld [vmem:[#allocation13 + $0x1e4] sm:$0xf0]  ;;  %v2312_v11 = vor.u32 %v2664_v2, %v2311_v1  ;;  %v2368_v28 = vor.u32 %v2678_v18, %v2367_v55  ;;  %v2271_v2 = vld [vmem:[#allocation13] sm:$0xf] }
  0xf7   :  { %1210 = vmatpush.bf16.msrb.mxu3 %v2172_v30  ;;  %v2512_v12 = vor.u32 %v2714_v10, %v2511_v9  ;;  %v2660_v30 = vld [vmem:[#allocation13 + $0x34] sm:$0xf0]  ;;  %v2407_v9 = vld [vmem:[#allocation13 + $0x110] sm:$0xf] }
  0xf8   :  { %1183 = vmatpush.bf16.msrb.mxu1 %v2180_v15  ;;  %v2376_v15 = vor.u32 %v2680_v4, %v2375_v3  ;;  %v2296_v37 = vor.u32 %v2660_v30, %v2295_v29  ;;  %v2654_v3 = vld [vmem:[#allocation13 + $0x4] sm:$0xf0]  ;;  %v2335_v4 = vld [vmem:[#allocation13 + $0x80] sm:$0xf]  ;;  %v2688_v10 = vld [vmem:[#allocation13 + $0x114] sm:$0xf0] }
  0xf9   :  { %v2272_v55 = vor.u32 %v2654_v3, %v2271_v2  ;;  %v2408_v18 = vor.u32 %v2688_v10, %v2407_v9  ;;  %v2385_v29 = vld [vmem:[#allocation13 + $0xe8] sm:$0xf0]  ;;  %v2399_v30 = vld [vmem:[#allocation13 + $0x100] sm:$0xf]  ;;  %v2505_v2 = vld [vmem:[#allocation13 + $0x1d8] sm:$0xf0] }
  0xfa   :  { %1171 = vmatpush.bf16.msrb.mxu0 %v2160_v23  ;;  %1198 = vmatpush.bf16.msrb.mxu2 %v2152_v40  ;;  %v2431_v23 = vld [vmem:[#allocation13 + $0x140] sm:$0xf]  ;;  %v2708_v40 = vld [vmem:[#allocation13 + $0x1b4] sm:$0xf0]  ;;  %v2361_v9 = vld [vmem:[#allocation13 + $0xb8] sm:$0xf0] }
  0xfb   :  { %1211 = vmatpush.bf16.msrb.mxu3 %v2156_v43  ;;  %v2432_v34 = vor.u32 %v2694_v25, %v2431_v23  ;;  %v2658_v43 = vld [vmem:[#allocation13 + $0x24] sm:$0xf0]  ;;  %v2472_v23 = vor.u32 %v2704_v17, %v2471_v16  ;;  %v2665_v25 = vld [vmem:[#allocation13 + $0x64] sm:$0xf]  ;;  %v2289_v17 = vld [vmem:[#allocation13 + $0x28] sm:$0xf0] }
  0xfc   :  { %1184 = vmatpush.bf16.msrb.mxu1 %v2164_v24  ;;  %v2304_v24 = vor.u32 %v2662_v14, %v2303_v13  ;;  %v2288_v51 = vor.u32 %v2658_v43, %v2287_v42  ;;  %v2329_v13 = vld [vmem:[#allocation13 + $0x78] sm:$0xf0]  ;;  %v2683_v14 = vld [vmem:[#allocation13 + $0xf4] sm:$0xf]  ;;  %v2657_v16 = vld [vmem:[#allocation13 + $0x24] sm:$0xf] }
  0xfd   :  { %v2663_v42 = vld [vmem:[#allocation13 + $0x54] sm:$0xf]  ;;  %v2313_v43 = vld [vmem:[#allocation13 + $0x58] sm:$0xf0] }
  0xfe   :  { %1172 = vmatpush.bf16.msrb.mxu0 %v2144_v35  ;;  %1641 = vmatpush.bf16.msra.mxu2 %v2456_v63  ;;  %v2496_v35 = vor.u32 %v2710_v27, %v2495_v26  ;;  %v2480_v63 = vor.u32 %v2706_v56, %v2479_v54  ;;  %v2321_v26 = vld [vmem:[#allocation13 + $0x68] sm:$0xf0]  ;;  %v2681_v27 = vld [vmem:[#allocation13 + $0xe4] sm:$0xf] }
  0xff   :  { %1654 = vmatpush.bf16.msra.mxu3 %v2520_v0  ;;  %v2513_v54 = vld [vmem:[#allocation13 + $0x1e8] sm:$0xf0] }
 0x100   :  { %1185 = vmatpush.bf16.msrb.mxu1 %v2148_v39  ;;  %v2487_v39 = vld [vmem:[#allocation13 + $0x1b0] sm:$0xf] }
 0x101   :  { %v2488_v49 = vor.u32 %v2708_v40, %v2487_v39  ;;  %v2715_v39 = vld [vmem:[#allocation13 + $0x1f4] sm:$0xf] }
 0x102   :  { %1615 = vmatpush.bf16.msra.mxu0 %v2328_v48  ;;  %1642 = vmatpush.bf16.msra.mxu2 %v2448_v8  ;;  %v2424_v48 = vor.u32 %v2692_v38, %v2423_v36  ;;  %v2670_v8 = vld [vmem:[#allocation13 + $0x84] sm:$0xf0]  ;;  %v2457_v38 = vld [vmem:[#allocation13 + $0x178] sm:$0xf0] }
 0x103   :  { %1655 = vmatpush.bf16.msra.mxu3 %v2512_v12  ;;  %v2667_v12 = vld [vmem:[#allocation13 + $0x74] sm:$0xf]  ;;  %v2336_v19 = vor.u32 %v2670_v8, %v2335_v4 }
 0x104   :  { %1628 = vmatpush.bf16.msra.mxu1 %v2392_v53  ;;  %v2690_v53 = vld [vmem:[#allocation13 + $0x124] sm:$0xf0]  ;;  %v2659_v4 = vld [vmem:[#allocation13 + $0x34] sm:$0xf] }
 0x106   :  { %1616 = vmatpush.bf16.msra.mxu0 %v2320_v58  ;;  %1643 = vmatpush.bf16.msra.mxu2 %v2440_v20  ;;  %v2279_v58 = vld [vmem:[#allocation13 + $0x10] sm:$0xf]  ;;  %v2332_v20 = vor.u32 %v2667_v12, %v2329_v13  ;;  %v2709_v12 = vld [vmem:[#allocation13 + $0x1c4] sm:$0xf] }
 0x107   :  { %1656 = vmatpush.bf16.msra.mxu3 %v2504_v21  ;;  %v2280_v1 = vor.u32 %v2656_v59, %v2279_v58  ;;  %v2305_v58 = vld [vmem:[#allocation13 + $0x48] sm:$0xf0]  ;;  %v2677_v59 = vld [vmem:[#allocation13 + $0xc4] sm:$0xf] }
 0x108   :  { %1629 = vmatpush.bf16.msra.mxu1 %v2384_v62  ;;  %v2416_v62 = vor.u32 %v2690_v53, %v2415_v50  ;;  %v2449_v50 = vld [vmem:[#allocation13 + $0x168] sm:$0xf0]  ;;  %v2713_v53 = vld [vmem:[#allocation13 + $0x1e4] sm:$0xf] }
 0x109   :  { %v2516_v56 = vor.u32 %v2713_v53, %v2513_v54 }
 0x10a   :  { %1617 = vmatpush.bf16.msra.mxu0 %v2312_v11  ;;  %1644 = vmatpush.bf16.msra.mxu2 %v2432_v34  ;;  %v2702_v34 = vld [vmem:[#allocation13 + $0x184] sm:$0xf0] }
 0x10b   :  { %1657 = vmatpush.bf16.msra.mxu3 %v2496_v35  ;;  %v2400_v35 = vor.u32 %v2686_v32, %v2399_v30  ;;  %v2464_v36 = vor.u32 %v2702_v34, %v2463_v33  ;;  %v2689_v32 = vld [vmem:[#allocation13 + $0x124] sm:$0xf]  ;;  %v2417_v33 = vld [vmem:[#allocation13 + $0x128] sm:$0xf0] }
 0x10c   :  { %1630 = vmatpush.bf16.msra.mxu1 %v2376_v15  ;;  %v2393_v15 = vld [vmem:[#allocation13 + $0xf8] sm:$0xf0] }
 0x10d   :  { %v2396_v21 = vor.u32 %v2683_v14, %v2393_v15  ;;  %v2497_v14 = vld [vmem:[#allocation13 + $0x1c8] sm:$0xf0] }
 0x10e   :  { %1618 = vmatpush.bf16.msra.mxu0 %v2304_v24  ;;  %1645 = vmatpush.bf16.msra.mxu2 %v2424_v48  ;;  %v2380_v48 = vor.u32 %v2679_v46, %v2377_v47  ;;  %v2500_v15 = vor.u32 %v2709_v12, %v2497_v14  ;;  %v2409_v46 = vld [vmem:[#allocation13 + $0x118] sm:$0xf0]  ;;  %v2703_v47 = vld [vmem:[#allocation13 + $0x194] sm:$0xf] }
 0x10f   :  { %1658 = vmatpush.bf16.msra.mxu3 %v2488_v49  ;;  %v2697_v49 = vld [vmem:[#allocation13 + $0x164] sm:$0xf] }
 0x110   :  { %1631 = vmatpush.bf16.msra.mxu1 %v2368_v28  ;;  %v2324_v28 = vor.u32 %v2665_v25, %v2321_v26  ;;  %v2489_v25 = vld [vmem:[#allocation13 + $0x1b8] sm:$0xf0] }
 0x112   :  { %1619 = vmatpush.bf16.msra.mxu0 %v2296_v37  ;;  %1646 = vmatpush.bf16.msra.mxu2 %v2416_v62  ;;  %v2699_v37 = vld [vmem:[#allocation13 + $0x174] sm:$0xf] }
 0x113   :  { %1659 = vmatpush.bf16.msra.mxu3 %v2480_v63  ;;  %v2460_v40 = vor.u32 %v2699_v37, %v2457_v38  ;;  %v2695_v62 = vld [vmem:[#allocation13 + $0x154] sm:$0xf]  ;;  %v2441_v63 = vld [vmem:[#allocation13 + $0x158] sm:$0xf0]  ;;  %v2481_v37 = vld [vmem:[#allocation13 + $0x1a8] sm:$0xf0] }
 0x114   :  { %1632 = vmatpush.bf16.msra.mxu1 %v2360_v41  ;;  %v2521_v41 = vld [vmem:[#allocation13 + $0x1f8] sm:$0xf0]  ;;  %v2653_v38 = vld [vmem:[#allocation13 + $0x4] sm:$0xf] }
 0x116   :  { %1620 = vmatpush.bf16.msra.mxu0 %v2288_v51  ;;  %1647 = vmatpush.bf16.msra.mxu2 %v2408_v18  ;;  %v2452_v51 = vor.u32 %v2697_v49, %v2449_v50  ;;  %v2353_v18 = vld [vmem:[#allocation13 + $0xa8] sm:$0xf0]  ;;  %v2473_v50 = vld [vmem:[#allocation13 + $0x198] sm:$0xf0] }
 0x117   :  { %1660 = vmatpush.bf16.msra.mxu3 %v2472_v23  ;;  %v2707_v23 = vld [vmem:[#allocation13 + $0x1b4] sm:$0xf] }
 0x118   :  { %1633 = vmatpush.bf16.msra.mxu1 %v2352_v57  ;;  %v2661_v57 = vld [vmem:[#allocation13 + $0x44] sm:$0xf]  ;;  %v2492_v26 = vor.u32 %v2707_v23, %v2489_v25 }
 0x11a   :  { %1621 = vmatpush.bf16.msra.mxu0 %v2280_v1  ;;  %1648 = vmatpush.bf16.msra.mxu2 %v2400_v35  ;;  %v2444_v1 = vor.u32 %v2695_v62, %v2441_v63  ;;  %v2420_v35 = vor.u32 %v2689_v32, %v2417_v33 }
 0x11b   :  { %1661 = vmatpush.bf16.msra.mxu3 %v2464_v36  ;;  %v2705_v36 = vld [vmem:[#allocation13 + $0x1a4] sm:$0xf] }
 0x11e   :  { %1622 = vmatpush.bf16.msra.mxu0 %v2272_v55  ;;  %v2292_v55 = vor.u32 %v2657_v16, %v2289_v17 }
 0x14a   :  { %v3086_v7 = vpop.f32.mrf.mxu0 }
 0x152   :  { %v3088_v22 = vpop.f32.mrf.mxu1  ;;  %v920_v31 = vpop.f32.mrf.mxu0 }
 0x153   :  { %v2732_v31 = vld [vmem:[%s3108_s4] ss:$0 sm:$0xff]  ;;  %s2990_s4 = smov [#allocation14]  }
 0x154   :  { %s1726_s22 = sshll.u32 %s2990_s4, 4  ;;  %s1727_s22 = int_to_ptr.vmem [resolvable:$true] %s1726_s22 }
 0x15a   :  { %v933_v44 = vpop.f32.mrf.mxu1 }
 0x15b   :  { %v919_v44 = vadd.f32 %v2732_v31, %v3086_v7  ;;  %v2343_v7 = vld [vmem:[#allocation13 + $0x90] sm:$0xf]  ;;  %v2388_v31 = vor.u32 %v2681_v27, %v2385_v29  ;;  %v2655_v27 = vld [vmem:[#allocation13 + $0x14] sm:$0xf] }
 0x15c   :  { %v2344_v6 = vor.u32 %v2672_v61, %v2343_v7  ;;  %v2369_v7 = vld [vmem:[#allocation13 + $0xc8] sm:$0xf0]  ;;  %v2671_v29 = vld [vmem:[#allocation13 + $0x94] sm:$0xf] }
 0x15d   :  { %v932_v60 = vadd.f32 %v3088_v22, %v919_v44  ;;  %v2524_v44 = vor.u32 %v2715_v39, %v2521_v41  ;;  %v2372_v61 = vor.u32 %v2677_v59, %v2369_v7  ;;  %v2484_v39 = vor.u32 %v2705_v36, %v2481_v37  ;;  %v2669_v41 = vld [vmem:[#allocation13 + $0x84] sm:$0xf] }
 0x15e   :  { %1634 = vmatpush.bf16.msra.mxu1 %v2344_v6  ;;  %v2675_v6 = vld [vmem:[#allocation13 + $0xb4] sm:$0xf] }
 0x15f   :  { %v2364_v10 = vor.u32 %v2675_v6, %v2361_v9 }
 0x162   :  { %1635 = vmatpush.bf16.msra.mxu1 %v2336_v19 }
 0x170   :  { %v944_v45 = vpop.f32.mrf.mxu2 }
 0x171   :  { %v945_v0 = vadd.f32 %v944_v45, %v932_v60  ;;  %v2316_v45 = vor.u32 %v2663_v42, %v2313_v43  ;;  %v2308_v60 = vor.u32 %v2661_v57, %v2305_v58  ;;  %v2337_v42 = vld [vmem:[#allocation13 + $0x88] sm:$0xf0]  ;;  %v2701_v58 = vld [vmem:[#allocation13 + $0x184] sm:$0xf] }
 0x172   :  { %v2401_v57 = vld [vmem:[#allocation13 + $0x108] sm:$0xf0] }
 0x178   :  { %v957_v5 = vpop.f32.mrf.mxu3  ;;  %v946_v22 = vpop.f32.mrf.mxu2 }
 0x179   :  { %v958_v11 = vadd.f32 %v957_v5, %v945_v0  ;;  %v2711_v0 = vld [vmem:[#allocation13 + $0x1d4] sm:$0xf]  ;;  %v2297_v5 = vld [vmem:[#allocation13 + $0x38] sm:$0xf0]  ;;  %v2433_v22 = vld [vmem:[#allocation13 + $0x148] sm:$0xf0] }
 0x17a   :  { %v2508_v3 = vor.u32 %v2711_v0, %v2505_v2  ;;  %v2300_v8 = vor.u32 %v2659_v4, %v2297_v5 }
 0x17b   :  { %961 = vst [vmem:[#allocation14] sm:$0xff] %v958_v11  ;;  %v962_v52 = vpack.c.bf16 %v958_v11, %v958_v11  ;;  %v2693_v11 = vld [vmem:[#allocation13 + $0x144] sm:$0xf] }
 0x17c   :  { %v2436_v13 = vor.u32 %v2693_v11, %v2433_v22  ;;  %1731 = dma.vmem_to_hbm [thread:$0]  %s1727_s22, 128, %s1729_s30, [#allocation4]  }
 0x17d   :  { %1173 = vmatmul.bf16.vlgmr.msrb.gmra.mxu0 %v962_v52  ;;  %1186 = vmatmul.bf16.vlgmr.msrb.gmra.mxu1 %v962_v52 }
 0x17e   :  { %1199 = vmatmul.bf16.vlgmr.msrb.gmra.mxu2 %v962_v52  ;;  %1212 = vmatmul.bf16.vlgmr.msrb.gmra.mxu3 %v962_v52  ;;  %v2673_v52 = vld [vmem:[#allocation13 + $0xa4] sm:$0xf] }
 0x17f   :  { %1667 = vmatpush.bf16.msrb.mxu0 %v2332_v20  ;;  %1680 = vmatpush.bf16.msrb.mxu1 %v2396_v21  ;;  %v2356_v19 = vor.u32 %v2673_v52, %v2353_v18  ;;  %v2691_v20 = vld [vmem:[#allocation13 + $0x134] sm:$0xf]  ;;  %v2425_v21 = vld [vmem:[#allocation13 + $0x138] sm:$0xf0]  ;;  %v1289_v18 = vld [vmem:[%s3112_s8] sm:$0x3] }
 0x180   :  { %v959_v24 = vpop.f32.mrf.mxu3  ;;  %1693 = vmatpush.bf16.msrb.mxu2 %v2460_v40  ;;  %1706 = vmatpush.bf16.msrb.mxu3 %v2524_v44  ;;  %v2273_v40 = vld [vmem:[#allocation13 + $0x8] sm:$0xf0]  ;;  %v2340_v44 = vor.u32 %v2669_v41, %v2337_v42  ;;  %v1292_v32 = vperm.slane %v1289_v18, 1  ;;  %s2991_s8 = smov [#allocation15]  }
 0x181   :  { %v2428_v24 = vor.u32 %v2691_v20, %v2425_v21  ;;  %v2276_v43 = vor.u32 %v2653_v38, %v2273_v40  ;;  %v1291_v20 = vperm.slane %v1289_v18, 0  ;;  %s1737_s9 = sshll.u32 %s2991_s8, 4  ;;  %s1738_s9 = int_to_ptr.vmem [resolvable:$true] %s1737_s9 }
 0x183   :  { %1668 = vmatpush.bf16.msrb.mxu0 %v2324_v28  ;;  %1681 = vmatpush.bf16.msrb.mxu1 %v2388_v31  ;;  %v2281_v28 = vld [vmem:[#allocation13 + $0x18] sm:$0xf0] }
 0x184   :  { %1694 = vmatpush.bf16.msrb.mxu2 %v2452_v51  ;;  %1707 = vmatpush.bf16.msrb.mxu3 %v2516_v56  ;;  %v2284_v30 = vor.u32 %v2655_v27, %v2281_v28  ;;  %v2345_v31 = vld [vmem:[#allocation13 + $0x98] sm:$0xf0]  ;;  %v2476_v51 = vor.u32 %v2703_v47, %v2473_v50  ;;  %v2685_v56 = vld [vmem:[#allocation13 + $0x104] sm:$0xf] }
 0x185   :  { %v2348_v34 = vor.u32 %v2671_v29, %v2345_v31  ;;  %v2404_v59 = vor.u32 %v2685_v56, %v2401_v57 }
 0x187   :  { %1669 = vmatpush.bf16.msrb.mxu0 %v2316_v45  ;;  %1682 = vmatpush.bf16.msrb.mxu1 %v2380_v48  ;;  %v2687_v45 = vld [vmem:[#allocation13 + $0x114] sm:$0xf]  ;;  %v995_v48 = vld [vmem:[#allocation11] sm:$0xf] }
 0x188   :  { %1695 = vmatpush.bf16.msrb.mxu2 %v2444_v1  ;;  %1708 = vmatpush.bf16.msrb.mxu3 %v2508_v3  ;;  %v2412_v49 = vor.u32 %v2687_v45, %v2409_v46  ;;  %v997_v53 = vperm.slane %v995_v48, 0  ;;  %v998_v54 = vperm.slane %v995_v48, 1  ;;  %v999_v1 = vperm.slane %v995_v48, 2 }
 0x189   :  { %v1000_v2 = vperm.slane %v995_v48, 3 }
 0x18b   :  { %1670 = vmatpush.bf16.msrb.mxu0 %v2308_v60  ;;  %1683 = vmatpush.bf16.msrb.mxu1 %v2372_v61  ;;  %v2465_v60 = vld [vmem:[#allocation13 + $0x188] sm:$0xf0] }
 0x18c   :  { %1696 = vmatpush.bf16.msrb.mxu2 %v2436_v13  ;;  %1709 = vmatpush.bf16.msrb.mxu3 %v2500_v15  ;;  %v2468_v7 = vor.u32 %v2701_v58, %v2465_v60 }
 0x18f   :  { %1671 = vmatpush.bf16.msrb.mxu0 %v2300_v8  ;;  %1684 = vmatpush.bf16.msrb.mxu1 %v2364_v10 }
 0x190   :  { %1697 = vmatpush.bf16.msrb.mxu2 %v2428_v24  ;;  %1710 = vmatpush.bf16.msrb.mxu3 %v2492_v26 }
 0x193   :  { %1672 = vmatpush.bf16.msrb.mxu0 %v2292_v55  ;;  %1685 = vmatpush.bf16.msrb.mxu1 %v2356_v19 }
 0x194   :  { %1698 = vmatpush.bf16.msrb.mxu2 %v2420_v35  ;;  %1711 = vmatpush.bf16.msrb.mxu3 %v2484_v39 }
 0x197   :  { %1673 = vmatpush.bf16.msrb.mxu0 %v2284_v30  ;;  %1686 = vmatpush.bf16.msrb.mxu1 %v2348_v34 }
 0x198   :  { %1699 = vmatpush.bf16.msrb.mxu2 %v2412_v49  ;;  %1712 = vmatpush.bf16.msrb.mxu3 %v2476_v51 }
 0x19b   :  { %1674 = vmatpush.bf16.msrb.mxu0 %v2276_v43  ;;  %1687 = vmatpush.bf16.msrb.mxu1 %v2340_v44 }
 0x19c   :  { %1700 = vmatpush.bf16.msrb.mxu2 %v2404_v59  ;;  %1713 = vmatpush.bf16.msrb.mxu3 %v2468_v7 }
 0x1fa   :  { %v1174_v61 = vpop.f32.mrf.mxu0  ;;  %v1187_v62 = vpop.f32.mrf.mxu1 }
 0x1fb   :  { %v1175_v63 = vadd.f32 %v1174_v61, %v997_v53  ;;  %v1188_v0 = vadd.f32 %v1187_v62, %v998_v54 }
 0x1fd   :  { %2741 = vtanh.f32 %v1175_v63 }
 0x1fe   :  { %2743 = vtanh.f32 %v1188_v0 }
 0x201   :  { %v1200_v3 = vpop.f32.mrf.mxu2  ;;  %v1213_v4 = vpop.f32.mrf.mxu3 }
 0x202   :  { %v1201_v5 = vadd.f32 %v1200_v3, %v999_v1  ;;  %v1214_v6 = vadd.f32 %v1213_v4, %v1000_v2  ;;  %v1176_v8 = vpop.f32.mrf.mxu0  ;;  %v1189_v9 = vpop.f32.mrf.mxu1 }
 0x203   :  { %v2742_v10 = vpop.eup %2741 }
 0x204   :  { %v2744_v11 = vpop.eup %2743  ;;  %v1221_v22 = vpack.c.bf16 %v2742_v10, %v2742_v10  ;;  %2745 = vtanh.f32 %v1201_v5 }
 0x205   :  { %v1222_v12 = vpack.c.bf16 %v2744_v11, %v2744_v11  ;;  %2747 = vtanh.f32 %v1214_v6 }
 0x206   :  { %1623 = vmatmul.bf16.vlgmr.msra.gmra.mxu0 %v1221_v22 }
 0x207   :  { %1636 = vmatmul.bf16.vlgmr.msra.gmra.mxu1 %v1222_v12 }
 0x209   :  { %v1202_v13 = vpop.f32.mrf.mxu2  ;;  %v1215_v14 = vpop.f32.mrf.mxu3 }
 0x20a   :  { %v2746_v15 = vpop.eup %2745 }
 0x20b   :  { %v2748_v16 = vpop.eup %2747  ;;  %v1223_v17 = vpack.c.bf16 %v2746_v15, %v2746_v15 }
 0x20c   :  { %v1224_v52 = vpack.c.bf16 %v2748_v16, %v2748_v16 }
 0x20d   :  { %1649 = vmatmul.bf16.vlgmr.msra.gmra.mxu2 %v1223_v17 }
 0x20e   :  { %1662 = vmatmul.bf16.vlgmr.msra.gmra.mxu3 %v1224_v52 }
 0x216   :  { %1675 = vmatmul.bf16.vlgmr.msrb.gmra.mxu0 %v1221_v22 }
 0x217   :  { %1688 = vmatmul.bf16.vlgmr.msrb.gmra.mxu1 %v1222_v12 }
 0x21d   :  { %1701 = vmatmul.bf16.vlgmr.msrb.gmra.mxu2 %v1223_v17 }
 0x21e   :  { %1714 = vmatmul.bf16.vlgmr.msrb.gmra.mxu3 %v1224_v52 }
 0x283   :  { %v1624_v55 = vpop.f32.mrf.mxu0 }
 0x284   :  { %v1637_v19 = vpop.f32.mrf.mxu1  ;;  %v1625_v21 = vadd.f32 %v1624_v55, %v1291_v20 }
 0x286   :  { %v1638_v25 = vadd.f32 %v1637_v19, %v1625_v21 }
 0x28b   :  { %v1626_v23 = vpop.f32.mrf.mxu0 }
 0x28c   :  { %v1639_v24 = vpop.f32.mrf.mxu1 }
 0x290   :  { %v1650_v26 = vpop.f32.mrf.mxu2 }
 0x291   :  { %v1651_v27 = vadd.f32 %v1650_v26, %v1638_v25  ;;  %v1663_v28 = vpop.f32.mrf.mxu3 }
 0x293   :  { %v1664_v29 = vadd.f32 %v1663_v28, %v1651_v27  ;;  %v1676_v30 = vpop.f32.mrf.mxu0 }
 0x294   :  { %v1689_v31 = vpop.f32.mrf.mxu1  ;;  %v1677_v35 = vadd.f32 %v1676_v30, %v1292_v32 }
 0x295   :  { %1719 = vst [vmem:[#allocation15] sm:$0xff] %v1664_v29 }
 0x296   :  { %v1690_v38 = vadd.f32 %v1689_v31, %v1677_v35 }
 0x298   :  { %v1652_v33 = vpop.f32.mrf.mxu2 }
 0x299   :  { %v1665_v34 = vpop.f32.mrf.mxu3 }
 0x29b   :  { %v1678_v36 = vpop.f32.mrf.mxu0 }
 0x29c   :  { %v1691_v37 = vpop.f32.mrf.mxu1 }
 0x2a0   :  { %v1702_v39 = vpop.f32.mrf.mxu2 }
 0x2a1   :  { %v1703_v40 = vadd.f32 %v1702_v39, %v1690_v38  ;;  %v1715_v41 = vpop.f32.mrf.mxu3 }
 0x2a3   :  { %v1716_v42 = vadd.f32 %v1715_v41, %v1703_v40 }
 0x2a5   :  { %1720 = vst [vmem:[#allocation15 + $0x8] sm:$0xff] %v1716_v42 }
 0x2a6   :  { %1742 = dma.vmem_to_hbm [thread:$0]  %s1738_s9, 256, %s1740_s15, [#allocation16]  }
 0x2a8   :  { %v1704_v43 = vpop.f32.mrf.mxu2 }
 0x2a9   :  { %v1717_v44 = vpop.f32.mrf.mxu3 }
 0x2aa   :  { %2973 = dma.done.wait [#allocation4], 128  }
 0x2ab   :  { %2974 = vsyncadd [#allocation4], 4294967168 }
 0x2ac   :  { %2975 = dma.done.wait [#allocation16], 256  }
 0x2ad   :  { %2976 = vsyncadd [#allocation16], 4294967040 }
 0x2ae   :  { %1751 = vsyncpa [#allocation3], 1 }
 0x2af   :  { %1752 = vsyncpa [#allocation6], 1 }
 0x2b0   :  { %1753 = vsyncpa [#allocation9], 1 }
 0x2b1   :  { %1754 = vsyncpa [#allocation12], 1 }
 0x2b2   :  { %1755 = vsyncpa [#allocation4], 1 }
 0x2b3   :  { %1756 = vsyncpa [#allocation16], 1 }

</bundles_post_ra>
